<compile_context>
chip_gen: v7x
topology: tpu7x:2x2x1
jax: 0.10.0
libtpu: 0.0.40
codegen_flags: <defaults>
</compile_context>

<pallas_src>
import math
import functools

import jax
import jax.numpy as jnp
from jax.experimental import pallas as pl
from jax.experimental.pallas import tpu as pltpu


def _round_up(x, m):
    return ((x + m - 1) // m) * m


# ---------------------------------------------------------------------------
# Fused ResnetFC kernel: one M-row tile per grid step, all weights VMEM-resident
# ---------------------------------------------------------------------------
def _make_resnetfc_kernel(n_blocks, n_lin_z, d_latent, beta):
    use_latent = d_latent > 0
    if beta > 0:
        act = lambda v: jax.nn.softplus(beta * v) * (1.0 / beta)  # nn.Softplus(beta)
    else:
        act = lambda v: jnp.maximum(v, 0.0)                       # nn.ReLU()

    def kernel(*refs):
        if use_latent:
            (zx_ref, w_in_ref, b_in_ref, wz_ref, bz_ref,
             w_blk_ref, b_blk_ref, w_out_ref, b_out_ref, o_ref) = refs
        else:
            (zx_ref, w_in_ref, b_in_ref,
             w_blk_ref, b_blk_ref, w_out_ref, b_out_ref, o_ref) = refs
            wz_ref = bz_ref = None

        zx = zx_ref[...]  # (tm, Dp) bf16, [z | x | zero-pad]

        # lin_in(x): combined weight has zero rows for the latent part of zx.
        x = jnp.dot(zx, w_in_ref[...], preferred_element_type=jnp.float32) + b_in_ref[...]

        for blk in range(n_blocks):
            if use_latent and blk < n_lin_z:
                # lin_z[blk](z): combined weight has zero rows for the x part of zx.
                x = x + (jnp.dot(zx, wz_ref[blk], preferred_element_type=jnp.float32)
                         + bz_ref[blk])
            # ResnetBlockFC (bn=False): net = fc_0(act(x)); dx = fc_1(act(net)); x = x + dx
            net = jnp.dot(act(x).astype(jnp.bfloat16), w_blk_ref[2 * blk],
                          preferred_element_type=jnp.float32) + b_blk_ref[2 * blk]
            dx = jnp.dot(act(net).astype(jnp.bfloat16), w_blk_ref[2 * blk + 1],
                         preferred_element_type=jnp.float32) + b_blk_ref[2 * blk + 1]
            x = x + dx

        out = jnp.dot(act(x).astype(jnp.bfloat16), w_out_ref[...],
                      preferred_element_type=jnp.float32) + b_out_ref[...]
        o_ref[...] = out.astype(o_ref.dtype)

    return kernel


def _full_spec(a):
    zeros = (0,) * a.ndim
    return pl.BlockSpec(a.shape, lambda i, _z=zeros: _z)


def resnetfc_forward(params, zx, cfg, *, tm=128):
    """zx: (..., d_latent + d_in) f32 -> (..., d_out) f32."""
    d_latent, d_in, d_out = cfg["d_latent"], cfg["d_in"], cfg["d_out"]
    n_blocks, n_lin_z, beta = cfg["n_blocks"], cfg["n_lin_z"], cfg["beta"]

    lead = zx.shape[:-1]
    D = zx.shape[-1]
    assert D == d_latent + d_in, (D, d_latent, d_in)
    M = math.prod(lead)
    Dp = params["w_in"].shape[0]
    Mp = _round_up(max(M, tm), tm)

    zx_flat = zx.reshape(M, D).astype(jnp.bfloat16)
    zx_p = jnp.pad(zx_flat, ((0, Mp - M), (0, Dp - D)))

    in_arrays = [zx_p, params["w_in"], params["b_in"]]
    in_specs = [pl.BlockSpec((tm, Dp), lambda i: (i, 0)),
                _full_spec(params["w_in"]), _full_spec(params["b_in"])]
    if d_latent > 0:
        in_arrays += [params["wz"], params["bz"]]
        in_specs += [_full_spec(params["wz"]), _full_spec(params["bz"])]
    in_arrays += [params["w_blk"], params["b_blk"], params["w_out"], params["b_out"]]
    in_specs += [_full_spec(params["w_blk"]), _full_spec(params["b_blk"]),
                 _full_spec(params["w_out"]), _full_spec(params["b_out"])]

    kernel = _make_resnetfc_kernel(n_blocks, n_lin_z, d_latent, beta)

    out = pl.pallas_call(
        kernel,
        out_shape=jax.ShapeDtypeStruct((Mp, d_out), jnp.float32),
        grid_spec=pltpu.PrefetchScalarGridSpec(
            num_scalar_prefetch=0,
            grid=(Mp // tm,),
            in_specs=in_specs,
            out_specs=pl.BlockSpec((tm, d_out), lambda i: (i, 0)),
        ),
        compiler_params=pltpu.CompilerParams(
            dimension_semantics=("parallel",),
        ),
    )(*in_arrays)

    if Mp != M:
        out = out[:M]
    return out.reshape(*lead, d_out)


# ---------------------------------------------------------------------------
# Parameters: deterministic synthetic init, packed directly into kernel layout
# ---------------------------------------------------------------------------
def init_params(key, *, d_in=6, d_out=4, n_blocks=5, d_latent=64, d_hidden=128,
                beta=0.0, combine_layer=1000):
    # TODO(synk): combine_interleaved (multiview reduction at combine_layer) not
    # implemented; requires combine_layer >= n_blocks or combine_inner_dims == (1,).
    # TODO(synk): bn=True (BatchNorm1d inside ResnetBlockFC) not implemented.
    # TODO(synk): use_spade=True (per-block scale_z path) not implemented.
    D = d_latent + d_in
    Dp = _round_up(max(D, 8), 128)
    n_lin_z = min(combine_layer, n_blocks) if d_latent > 0 else 0

    keys = iter(jax.random.split(key, 4 + n_lin_z + 2 * n_blocks))

    def kaiming(k, fan_in, fan_out):
        # kaiming_normal_(a=0, mode='fan_in'), stored transposed as (fan_in, fan_out)
        return jax.random.normal(k, (fan_in, fan_out), jnp.float32) * math.sqrt(2.0 / fan_in)

    # lin_in, combined over the padded [z | x] layout (rows d_latent..d_latent+d_in-1 active)
    w_in = jnp.zeros((Dp, d_hidden), jnp.float32)
    if d_in > 0:
        w_in = w_in.at[d_latent:d_latent + d_in].set(kaiming(next(keys), d_in, d_hidden))
    b_in = jnp.zeros((1, d_hidden), jnp.float32)

    # lin_z[blk], combined (rows 0..d_latent-1 active)
    if d_latent > 0:
        wz = []
        for _ in range(n_lin_z):
            w = jnp.zeros((Dp, d_hidden), jnp.float32)
            w = w.at[:d_latent].set(kaiming(next(keys), d_latent, d_hidden))
            wz.append(w)
        wz = jnp.stack(wz).astype(jnp.bfloat16)          # (n_lin_z, Dp, H)
        bz = jnp.zeros((n_lin_z, 1, d_hidden), jnp.float32)
    else:
        wz = bz = None

    # ResnetBlockFC fc_0 / fc_1 weights stacked as (2*n_blocks, H, H)
    w_blk = []
    for _ in range(n_blocks):
        w_blk.append(kaiming(next(keys), d_hidden, d_hidden))  # fc_0
        # PyTorch zero-inits fc_1; small random here so the test is non-degenerate.
        w_blk.append(jax.random.normal(next(keys), (d_hidden, d_hidden), jnp.float32)
                     * (0.1 * math.sqrt(2.0 / d_hidden)))       # fc_1
    w_blk = jnp.stack(w_blk).astype(jnp.bfloat16)
    b_blk = jnp.zeros((2 * n_blocks, 1, d_hidden), jnp.float32)

    w_out = kaiming(next(keys), d_hidden, d_out).astype(jnp.bfloat16)
    b_out = jnp.zeros((1, d_out), jnp.float32)

    params = {"w_in": w_in.astype(jnp.bfloat16), "b_in": b_in,
              "w_blk": w_blk, "b_blk": b_blk,
              "w_out": w_out, "b_out": b_out}
    if d_latent > 0:
        params["wz"] = wz
        params["bz"] = bz

    cfg = dict(d_in=d_in, d_out=d_out, n_blocks=n_blocks, d_latent=d_latent,
               d_hidden=d_hidden, beta=beta, n_lin_z=n_lin_z)
    return params, cfg


# ---------------------------------------------------------------------------
# Pure-JAX reference (same math / same bf16 operand casts) for validation
# ---------------------------------------------------------------------------
def resnetfc_reference(params, zx, cfg):
    d_latent, n_blocks, n_lin_z, beta = (cfg["d_latent"], cfg["n_blocks"],
                                         cfg["n_lin_z"], cfg["beta"])
    act = (lambda v: jax.nn.softplus(beta * v) / beta) if beta > 0 else (
        lambda v: jnp.maximum(v, 0.0))
    lead = zx.shape[:-1]
    D = zx.shape[-1]
    Dp = params["w_in"].shape[0]
    zxp = jnp.pad(zx.reshape(-1, D), ((0, 0), (0, Dp - D))).astype(jnp.bfloat16)
    f32 = jnp.float32
    x = jnp.dot(zxp, params["w_in"], preferred_element_type=f32) + params["b_in"]
    for blk in range(n_blocks):
        if d_latent > 0 and blk < n_lin_z:
            x = x + jnp.dot(zxp, params["wz"][blk], preferred_element_type=f32) + params["bz"][blk]
        net = jnp.dot(act(x).astype(jnp.bfloat16), params["w_blk"][2 * blk],
                      preferred_element_type=f32) + params["b_blk"][2 * blk]
        dx = jnp.dot(act(net).astype(jnp.bfloat16), params["w_blk"][2 * blk + 1],
                     preferred_element_type=f32) + params["b_blk"][2 * blk + 1]
        x = x + dx
    out = jnp.dot(act(x).astype(jnp.bfloat16), params["w_out"],
                  preferred_element_type=f32) + params["b_out"]
    return out.reshape(*lead, cfg["d_out"])


# ---------------------------------------------------------------------------
if __name__ == "__main__":
    key = jax.random.PRNGKey(0)
    pkey, xkey = jax.random.split(key)

    # ResnetFC(d_in=6, d_out=4, n_blocks=5, d_latent=64, d_hidden=128, beta=0.0)
    params, cfg = init_params(pkey, d_in=6, d_out=4, n_blocks=5, d_latent=64,
                              d_hidden=128, beta=0.0, combine_layer=1000)

    SB, NR = 2, 128  # 2 "views" x 128 rays/points -> 256 flattened rows
    zx = jax.random.normal(xkey, (SB, NR, cfg["d_latent"] + cfg["d_in"]), jnp.float32)

    fwd = jax.jit(functools.partial(resnetfc_forward, cfg=cfg))
    out = fwd(params, zx)
    jax.block_until_ready(out)

    ref = resnetfc_reference(params, zx, cfg)
    assert out.shape == (SB, NR, cfg["d_out"]), out.shape
    assert bool(jnp.all(jnp.isfinite(out)))
    err = float(jnp.max(jnp.abs(out - ref)))
    assert err < 5e-2, f"max abs err vs reference: {err}"
    print("KERNEL_OK")
</pallas_src>

<mosaic_0001>
module attributes {stable_mosaic.version = 11 : i64} {
  func.func @kernel(%arg0: i32, %arg1: memref<128x128xbf16, #tpu.memory_space<vmem>>, %arg2: memref<128x128xbf16, #tpu.memory_space<vmem>>, %arg3: memref<1x128xf32, #tpu.memory_space<vmem>>, %arg4: memref<5x128x128xbf16, #tpu.memory_space<vmem>>, %arg5: memref<5x1x128xf32, #tpu.memory_space<vmem>>, %arg6: memref<10x128x128xbf16, #tpu.memory_space<vmem>>, %arg7: memref<10x1x128xf32, #tpu.memory_space<vmem>>, %arg8: memref<128x4xbf16, #tpu.memory_space<vmem>>, %arg9: memref<1x4xf32, #tpu.memory_space<vmem>>, %arg10: memref<128x4xf32, #tpu.memory_space<vmem>>) attributes {dimension_semantics = [#tpu.dimension_semantics<parallel>], iteration_bounds = array<i64: 2>, scalar_prefetch = 0 : i64, scratch_operands = 0 : i64, tpu.core_type = #tpu.core_type<tc>, window_params = [{transform_indices = @transform_0, window_bounds = array<i64: 128, 128>}, {pipeline_mode = #tpu.pipeline_mode<synchronous>, transform_indices = @transform_1, window_bounds = array<i64: 128, 128>}, {pipeline_mode = #tpu.pipeline_mode<synchronous>, transform_indices = @transform_2, window_bounds = array<i64: 1, 128>}, {pipeline_mode = #tpu.pipeline_mode<synchronous>, transform_indices = @transform_3, window_bounds = array<i64: 5, 128, 128>}, {pipeline_mode = #tpu.pipeline_mode<synchronous>, transform_indices = @transform_4, window_bounds = array<i64: 5, 1, 128>}, {pipeline_mode = #tpu.pipeline_mode<synchronous>, transform_indices = @transform_5, window_bounds = array<i64: 10, 128, 128>}, {pipeline_mode = #tpu.pipeline_mode<synchronous>, transform_indices = @transform_6, window_bounds = array<i64: 10, 1, 128>}, {pipeline_mode = #tpu.pipeline_mode<synchronous>, transform_indices = @transform_7, window_bounds = array<i64: 128, 4>}, {pipeline_mode = #tpu.pipeline_mode<synchronous>, transform_indices = @transform_8, window_bounds = array<i64: 1, 4>}, {transform_indices = @transform_9, window_bounds = array<i64: 128, 4>}]} {
    %c0 = arith.constant 0 : index
    %c0_0 = arith.constant 0 : index
    %0 = vector.load %arg1[%c0, %c0_0] : memref<128x128xbf16, #tpu.memory_space<vmem>>, vector<128x128xbf16>
    %c0_1 = arith.constant 0 : index
    %c0_2 = arith.constant 0 : index
    %1 = vector.load %arg2[%c0_1, %c0_2] : memref<128x128xbf16, #tpu.memory_space<vmem>>, vector<128x128xbf16>
    %cst = arith.constant dense<0.000000e+00> : vector<128x128xf32>
    %2 = tpu.matmul %0, %1, %cst {dimension_numbers = #tpu.dot_dimension_numbers<[1], [0], [0], [1], [0, 0, 1, 1], [], []>} : vector<128x128xbf16>, vector<128x128xbf16>, vector<128x128xf32> -> vector<128x128xf32>
    %c0_3 = arith.constant 0 : index
    %c0_4 = arith.constant 0 : index
    %3 = vector.load %arg3[%c0_3, %c0_4] : memref<1x128xf32, #tpu.memory_space<vmem>>, vector<1x128xf32>
    %4 = vector.broadcast %3 : vector<1x128xf32> to vector<128x128xf32>
    %5 = arith.addf %2, %4 : vector<128x128xf32>
    %c0_5 = arith.constant 0 : index
    %c0_6 = arith.constant 0 : index
    %c0_7 = arith.constant 0 : index
    %6 = vector.load %arg4[%c0_5, %c0_6, %c0_7] : memref<5x128x128xbf16, #tpu.memory_space<vmem>>, vector<1x128x128xbf16>
    %7 = vector.shape_cast %6 : vector<1x128x128xbf16> to vector<128x128xbf16>
    %cst_8 = arith.constant dense<0.000000e+00> : vector<128x128xf32>
    %8 = tpu.matmul %0, %7, %cst_8 {dimension_numbers = #tpu.dot_dimension_numbers<[1], [0], [0], [1], [0, 0, 1, 1], [], []>} : vector<128x128xbf16>, vector<128x128xbf16>, vector<128x128xf32> -> vector<128x128xf32>
    %c0_9 = arith.constant 0 : index
    %c0_10 = arith.constant 0 : index
    %c0_11 = arith.constant 0 : index
    %9 = vector.load %arg5[%c0_9, %c0_10, %c0_11] : memref<5x1x128xf32, #tpu.memory_space<vmem>>, vector<1x1x128xf32>
    %10 = vector.shape_cast %9 : vector<1x1x128xf32> to vector<1x128xf32>
    %11 = vector.broadcast %10 : vector<1x128xf32> to vector<128x128xf32>
    %12 = arith.addf %8, %11 : vector<128x128xf32>
    %13 = arith.addf %5, %12 : vector<128x128xf32>
    %cst_12 = arith.constant 0.000000e+00 : f32
    %14 = vector.broadcast %cst_12 : f32 to vector<128x128xf32>
    %15 = arith.maximumf %13, %14 : vector<128x128xf32>
    %16 = arith.truncf %15 : vector<128x128xf32> to vector<128x128xbf16>
    %c0_13 = arith.constant 0 : index
    %c0_14 = arith.constant 0 : index
    %c0_15 = arith.constant 0 : index
    %17 = vector.load %arg6[%c0_13, %c0_14, %c0_15] : memref<10x128x128xbf16, #tpu.memory_space<vmem>>, vector<1x128x128xbf16>
    %18 = vector.shape_cast %17 : vector<1x128x128xbf16> to vector<128x128xbf16>
    %cst_16 = arith.constant dense<0.000000e+00> : vector<128x128xf32>
    %19 = tpu.matmul %16, %18, %cst_16 {dimension_numbers = #tpu.dot_dimension_numbers<[1], [0], [0], [1], [0, 0, 1, 1], [], []>} : vector<128x128xbf16>, vector<128x128xbf16>, vector<128x128xf32> -> vector<128x128xf32>
    %c0_17 = arith.constant 0 : index
    %c0_18 = arith.constant 0 : index
    %c0_19 = arith.constant 0 : index
    %20 = vector.load %arg7[%c0_17, %c0_18, %c0_19] : memref<10x1x128xf32, #tpu.memory_space<vmem>>, vector<1x1x128xf32>
    %21 = vector.shape_cast %20 : vector<1x1x128xf32> to vector<1x128xf32>
    %22 = vector.broadcast %21 : vector<1x128xf32> to vector<128x128xf32>
    %23 = arith.addf %19, %22 : vector<128x128xf32>
    %cst_20 = arith.constant 0.000000e+00 : f32
    %24 = vector.broadcast %cst_20 : f32 to vector<128x128xf32>
    %25 = arith.maximumf %23, %24 : vector<128x128xf32>
    %26 = arith.truncf %25 : vector<128x128xf32> to vector<128x128xbf16>
    %c1 = arith.constant 1 : index
    %c0_21 = arith.constant 0 : index
    %c0_22 = arith.constant 0 : index
    %27 = vector.load %arg6[%c1, %c0_21, %c0_22] : memref<10x128x128xbf16, #tpu.memory_space<vmem>>, vector<1x128x128xbf16>
    %28 = vector.shape_cast %27 : vector<1x128x128xbf16> to vector<128x128xbf16>
    %cst_23 = arith.constant dense<0.000000e+00> : vector<128x128xf32>
    %29 = tpu.matmul %26, %28, %cst_23 {dimension_numbers = #tpu.dot_dimension_numbers<[1], [0], [0], [1], [0, 0, 1, 1], [], []>} : vector<128x128xbf16>, vector<128x128xbf16>, vector<128x128xf32> -> vector<128x128xf32>
    %c1_24 = arith.constant 1 : index
    %c0_25 = arith.constant 0 : index
    %c0_26 = arith.constant 0 : index
    %30 = vector.load %arg7[%c1_24, %c0_25, %c0_26] : memref<10x1x128xf32, #tpu.memory_space<vmem>>, vector<1x1x128xf32>
    %31 = vector.shape_cast %30 : vector<1x1x128xf32> to vector<1x128xf32>
    %32 = vector.broadcast %31 : vector<1x128xf32> to vector<128x128xf32>
    %33 = arith.addf %29, %32 : vector<128x128xf32>
    %34 = arith.addf %13, %33 : vector<128x128xf32>
    %c1_27 = arith.constant 1 : index
    %c0_28 = arith.constant 0 : index
    %c0_29 = arith.constant 0 : index
    %35 = vector.load %arg4[%c1_27, %c0_28, %c0_29] : memref<5x128x128xbf16, #tpu.memory_space<vmem>>, vector<1x128x128xbf16>
    %36 = vector.shape_cast %35 : vector<1x128x128xbf16> to vector<128x128xbf16>
    %cst_30 = arith.constant dense<0.000000e+00> : vector<128x128xf32>
    %37 = tpu.matmul %0, %36, %cst_30 {dimension_numbers = #tpu.dot_dimension_numbers<[1], [0], [0], [1], [0, 0, 1, 1], [], []>} : vector<128x128xbf16>, vector<128x128xbf16>, vector<128x128xf32> -> vector<128x128xf32>
    %c1_31 = arith.constant 1 : index
    %c0_32 = arith.constant 0 : index
    %c0_33 = arith.constant 0 : index
    %38 = vector.load %arg5[%c1_31, %c0_32, %c0_33] : memref<5x1x128xf32, #tpu.memory_space<vmem>>, vector<1x1x128xf32>
    %39 = vector.shape_cast %38 : vector<1x1x128xf32> to vector<1x128xf32>
    %40 = vector.broadcast %39 : vector<1x128xf32> to vector<128x128xf32>
    %41 = arith.addf %37, %40 : vector<128x128xf32>
    %42 = arith.addf %34, %41 : vector<128x128xf32>
    %cst_34 = arith.constant 0.000000e+00 : f32
    %43 = vector.broadcast %cst_34 : f32 to vector<128x128xf32>
    %44 = arith.maximumf %42, %43 : vector<128x128xf32>
    %45 = arith.truncf %44 : vector<128x128xf32> to vector<128x128xbf16>
    %c2 = arith.constant 2 : index
    %c0_35 = arith.constant 0 : index
    %c0_36 = arith.constant 0 : index
    %46 = vector.load %arg6[%c2, %c0_35, %c0_36] : memref<10x128x128xbf16, #tpu.memory_space<vmem>>, vector<1x128x128xbf16>
    %47 = vector.shape_cast %46 : vector<1x128x128xbf16> to vector<128x128xbf16>
    %cst_37 = arith.constant dense<0.000000e+00> : vector<128x128xf32>
    %48 = tpu.matmul %45, %47, %cst_37 {dimension_numbers = #tpu.dot_dimension_numbers<[1], [0], [0], [1], [0, 0, 1, 1], [], []>} : vector<128x128xbf16>, vector<128x128xbf16>, vector<128x128xf32> -> vector<128x128xf32>
    %c2_38 = arith.constant 2 : index
    %c0_39 = arith.constant 0 : index
    %c0_40 = arith.constant 0 : index
    %49 = vector.load %arg7[%c2_38, %c0_39, %c0_40] : memref<10x1x128xf32, #tpu.memory_space<vmem>>, vector<1x1x128xf32>
    %50 = vector.shape_cast %49 : vector<1x1x128xf32> to vector<1x128xf32>
    %51 = vector.broadcast %50 : vector<1x128xf32> to vector<128x128xf32>
    %52 = arith.addf %48, %51 : vector<128x128xf32>
    %cst_41 = arith.constant 0.000000e+00 : f32
    %53 = vector.broadcast %cst_41 : f32 to vector<128x128xf32>
    %54 = arith.maximumf %52, %53 : vector<128x128xf32>
    %55 = arith.truncf %54 : vector<128x128xf32> to vector<128x128xbf16>
    %c3 = arith.constant 3 : index
    %c0_42 = arith.constant 0 : index
    %c0_43 = arith.constant 0 : index
    %56 = vector.load %arg6[%c3, %c0_42, %c0_43] : memref<10x128x128xbf16, #tpu.memory_space<vmem>>, vector<1x128x128xbf16>
    %57 = vector.shape_cast %56 : vector<1x128x128xbf16> to vector<128x128xbf16>
    %cst_44 = arith.constant dense<0.000000e+00> : vector<128x128xf32>
    %58 = tpu.matmul %55, %57, %cst_44 {dimension_numbers = #tpu.dot_dimension_numbers<[1], [0], [0], [1], [0, 0, 1, 1], [], []>} : vector<128x128xbf16>, vector<128x128xbf16>, vector<128x128xf32> -> vector<128x128xf32>
    %c3_45 = arith.constant 3 : index
    %c0_46 = arith.constant 0 : index
    %c0_47 = arith.constant 0 : index
    %59 = vector.load %arg7[%c3_45, %c0_46, %c0_47] : memref<10x1x128xf32, #tpu.memory_space<vmem>>, vector<1x1x128xf32>
    %60 = vector.shape_cast %59 : vector<1x1x128xf32> to vector<1x128xf32>
    %61 = vector.broadcast %60 : vector<1x128xf32> to vector<128x128xf32>
    %62 = arith.addf %58, %61 : vector<128x128xf32>
    %63 = arith.addf %42, %62 : vector<128x128xf32>
    %c2_48 = arith.constant 2 : index
    %c0_49 = arith.constant 0 : index
    %c0_50 = arith.constant 0 : index
    %64 = vector.load %arg4[%c2_48, %c0_49, %c0_50] : memref<5x128x128xbf16, #tpu.memory_space<vmem>>, vector<1x128x128xbf16>
    %65 = vector.shape_cast %64 : vector<1x128x128xbf16> to vector<128x128xbf16>
    %cst_51 = arith.constant dense<0.000000e+00> : vector<128x128xf32>
    %66 = tpu.matmul %0, %65, %cst_51 {dimension_numbers = #tpu.dot_dimension_numbers<[1], [0], [0], [1], [0, 0, 1, 1], [], []>} : vector<128x128xbf16>, vector<128x128xbf16>, vector<128x128xf32> -> vector<128x128xf32>
    %c2_52 = arith.constant 2 : index
    %c0_53 = arith.constant 0 : index
    %c0_54 = arith.constant 0 : index
    %67 = vector.load %arg5[%c2_52, %c0_53, %c0_54] : memref<5x1x128xf32, #tpu.memory_space<vmem>>, vector<1x1x128xf32>
    %68 = vector.shape_cast %67 : vector<1x1x128xf32> to vector<1x128xf32>
    %69 = vector.broadcast %68 : vector<1x128xf32> to vector<128x128xf32>
    %70 = arith.addf %66, %69 : vector<128x128xf32>
    %71 = arith.addf %63, %70 : vector<128x128xf32>
    %cst_55 = arith.constant 0.000000e+00 : f32
    %72 = vector.broadcast %cst_55 : f32 to vector<128x128xf32>
    %73 = arith.maximumf %71, %72 : vector<128x128xf32>
    %74 = arith.truncf %73 : vector<128x128xf32> to vector<128x128xbf16>
    %c4 = arith.constant 4 : index
    %c0_56 = arith.constant 0 : index
    %c0_57 = arith.constant 0 : index
    %75 = vector.load %arg6[%c4, %c0_56, %c0_57] : memref<10x128x128xbf16, #tpu.memory_space<vmem>>, vector<1x128x128xbf16>
    %76 = vector.shape_cast %75 : vector<1x128x128xbf16> to vector<128x128xbf16>
    %cst_58 = arith.constant dense<0.000000e+00> : vector<128x128xf32>
    %77 = tpu.matmul %74, %76, %cst_58 {dimension_numbers = #tpu.dot_dimension_numbers<[1], [0], [0], [1], [0, 0, 1, 1], [], []>} : vector<128x128xbf16>, vector<128x128xbf16>, vector<128x128xf32> -> vector<128x128xf32>
    %c4_59 = arith.constant 4 : index
    %c0_60 = arith.constant 0 : index
    %c0_61 = arith.constant 0 : index
    %78 = vector.load %arg7[%c4_59, %c0_60, %c0_61] : memref<10x1x128xf32, #tpu.memory_space<vmem>>, vector<1x1x128xf32>
    %79 = vector.shape_cast %78 : vector<1x1x128xf32> to vector<1x128xf32>
    %80 = vector.broadcast %79 : vector<1x128xf32> to vector<128x128xf32>
    %81 = arith.addf %77, %80 : vector<128x128xf32>
    %cst_62 = arith.constant 0.000000e+00 : f32
    %82 = vector.broadcast %cst_62 : f32 to vector<128x128xf32>
    %83 = arith.maximumf %81, %82 : vector<128x128xf32>
    %84 = arith.truncf %83 : vector<128x128xf32> to vector<128x128xbf16>
    %c5 = arith.constant 5 : index
    %c0_63 = arith.constant 0 : index
    %c0_64 = arith.constant 0 : index
    %85 = vector.load %arg6[%c5, %c0_63, %c0_64] : memref<10x128x128xbf16, #tpu.memory_space<vmem>>, vector<1x128x128xbf16>
    %86 = vector.shape_cast %85 : vector<1x128x128xbf16> to vector<128x128xbf16>
    %cst_65 = arith.constant dense<0.000000e+00> : vector<128x128xf32>
    %87 = tpu.matmul %84, %86, %cst_65 {dimension_numbers = #tpu.dot_dimension_numbers<[1], [0], [0], [1], [0, 0, 1, 1], [], []>} : vector<128x128xbf16>, vector<128x128xbf16>, vector<128x128xf32> -> vector<128x128xf32>
    %c5_66 = arith.constant 5 : index
    %c0_67 = arith.constant 0 : index
    %c0_68 = arith.constant 0 : index
    %88 = vector.load %arg7[%c5_66, %c0_67, %c0_68] : memref<10x1x128xf32, #tpu.memory_space<vmem>>, vector<1x1x128xf32>
    %89 = vector.shape_cast %88 : vector<1x1x128xf32> to vector<1x128xf32>
    %90 = vector.broadcast %89 : vector<1x128xf32> to vector<128x128xf32>
    %91 = arith.addf %87, %90 : vector<128x128xf32>
    %92 = arith.addf %71, %91 : vector<128x128xf32>
    %c3_69 = arith.constant 3 : index
    %c0_70 = arith.constant 0 : index
    %c0_71 = arith.constant 0 : index
    %93 = vector.load %arg4[%c3_69, %c0_70, %c0_71] : memref<5x128x128xbf16, #tpu.memory_space<vmem>>, vector<1x128x128xbf16>
    %94 = vector.shape_cast %93 : vector<1x128x128xbf16> to vector<128x128xbf16>
    %cst_72 = arith.constant dense<0.000000e+00> : vector<128x128xf32>
    %95 = tpu.matmul %0, %94, %cst_72 {dimension_numbers = #tpu.dot_dimension_numbers<[1], [0], [0], [1], [0, 0, 1, 1], [], []>} : vector<128x128xbf16>, vector<128x128xbf16>, vector<128x128xf32> -> vector<128x128xf32>
    %c3_73 = arith.constant 3 : index
    %c0_74 = arith.constant 0 : index
    %c0_75 = arith.constant 0 : index
    %96 = vector.load %arg5[%c3_73, %c0_74, %c0_75] : memref<5x1x128xf32, #tpu.memory_space<vmem>>, vector<1x1x128xf32>
    %97 = vector.shape_cast %96 : vector<1x1x128xf32> to vector<1x128xf32>
    %98 = vector.broadcast %97 : vector<1x128xf32> to vector<128x128xf32>
    %99 = arith.addf %95, %98 : vector<128x128xf32>
    %100 = arith.addf %92, %99 : vector<128x128xf32>
    %cst_76 = arith.constant 0.000000e+00 : f32
    %101 = vector.broadcast %cst_76 : f32 to vector<128x128xf32>
    %102 = arith.maximumf %100, %101 : vector<128x128xf32>
    %103 = arith.truncf %102 : vector<128x128xf32> to vector<128x128xbf16>
    %c6 = arith.constant 6 : index
    %c0_77 = arith.constant 0 : index
    %c0_78 = arith.constant 0 : index
    %104 = vector.load %arg6[%c6, %c0_77, %c0_78] : memref<10x128x128xbf16, #tpu.memory_space<vmem>>, vector<1x128x128xbf16>
    %105 = vector.shape_cast %104 : vector<1x128x128xbf16> to vector<128x128xbf16>
    %cst_79 = arith.constant dense<0.000000e+00> : vector<128x128xf32>
    %106 = tpu.matmul %103, %105, %cst_79 {dimension_numbers = #tpu.dot_dimension_numbers<[1], [0], [0], [1], [0, 0, 1, 1], [], []>} : vector<128x128xbf16>, vector<128x128xbf16>, vector<128x128xf32> -> vector<128x128xf32>
    %c6_80 = arith.constant 6 : index
    %c0_81 = arith.constant 0 : index
    %c0_82 = arith.constant 0 : index
    %107 = vector.load %arg7[%c6_80, %c0_81, %c0_82] : memref<10x1x128xf32, #tpu.memory_space<vmem>>, vector<1x1x128xf32>
    %108 = vector.shape_cast %107 : vector<1x1x128xf32> to vector<1x128xf32>
    %109 = vector.broadcast %108 : vector<1x128xf32> to vector<128x128xf32>
    %110 = arith.addf %106, %109 : vector<128x128xf32>
    %cst_83 = arith.constant 0.000000e+00 : f32
    %111 = vector.broadcast %cst_83 : f32 to vector<128x128xf32>
    %112 = arith.maximumf %110, %111 : vector<128x128xf32>
    %113 = arith.truncf %112 : vector<128x128xf32> to vector<128x128xbf16>
    %c7 = arith.constant 7 : index
    %c0_84 = arith.constant 0 : index
    %c0_85 = arith.constant 0 : index
    %114 = vector.load %arg6[%c7, %c0_84, %c0_85] : memref<10x128x128xbf16, #tpu.memory_space<vmem>>, vector<1x128x128xbf16>
    %115 = vector.shape_cast %114 : vector<1x128x128xbf16> to vector<128x128xbf16>
    %cst_86 = arith.constant dense<0.000000e+00> : vector<128x128xf32>
    %116 = tpu.matmul %113, %115, %cst_86 {dimension_numbers = #tpu.dot_dimension_numbers<[1], [0], [0], [1], [0, 0, 1, 1], [], []>} : vector<128x128xbf16>, vector<128x128xbf16>, vector<128x128xf32> -> vector<128x128xf32>
    %c7_87 = arith.constant 7 : index
    %c0_88 = arith.constant 0 : index
    %c0_89 = arith.constant 0 : index
    %117 = vector.load %arg7[%c7_87, %c0_88, %c0_89] : memref<10x1x128xf32, #tpu.memory_space<vmem>>, vector<1x1x128xf32>
    %118 = vector.shape_cast %117 : vector<1x1x128xf32> to vector<1x128xf32>
    %119 = vector.broadcast %118 : vector<1x128xf32> to vector<128x128xf32>
    %120 = arith.addf %116, %119 : vector<128x128xf32>
    %121 = arith.addf %100, %120 : vector<128x128xf32>
    %c4_90 = arith.constant 4 : index
    %c0_91 = arith.constant 0 : index
    %c0_92 = arith.constant 0 : index
    %122 = vector.load %arg4[%c4_90, %c0_91, %c0_92] : memref<5x128x128xbf16, #tpu.memory_space<vmem>>, vector<1x128x128xbf16>
    %123 = vector.shape_cast %122 : vector<1x128x128xbf16> to vector<128x128xbf16>
    %cst_93 = arith.constant dense<0.000000e+00> : vector<128x128xf32>
    %124 = tpu.matmul %0, %123, %cst_93 {dimension_numbers = #tpu.dot_dimension_numbers<[1], [0], [0], [1], [0, 0, 1, 1], [], []>} : vector<128x128xbf16>, vector<128x128xbf16>, vector<128x128xf32> -> vector<128x128xf32>
    %c4_94 = arith.constant 4 : index
    %c0_95 = arith.constant 0 : index
    %c0_96 = arith.constant 0 : index
    %125 = vector.load %arg5[%c4_94, %c0_95, %c0_96] : memref<5x1x128xf32, #tpu.memory_space<vmem>>, vector<1x1x128xf32>
    %126 = vector.shape_cast %125 : vector<1x1x128xf32> to vector<1x128xf32>
    %127 = vector.broadcast %126 : vector<1x128xf32> to vector<128x128xf32>
    %128 = arith.addf %124, %127 : vector<128x128xf32>
    %129 = arith.addf %121, %128 : vector<128x128xf32>
    %cst_97 = arith.constant 0.000000e+00 : f32
    %130 = vector.broadcast %cst_97 : f32 to vector<128x128xf32>
    %131 = arith.maximumf %129, %130 : vector<128x128xf32>
    %132 = arith.truncf %131 : vector<128x128xf32> to vector<128x128xbf16>
    %c8 = arith.constant 8 : index
    %c0_98 = arith.constant 0 : index
    %c0_99 = arith.constant 0 : index
    %133 = vector.load %arg6[%c8, %c0_98, %c0_99] : memref<10x128x128xbf16, #tpu.memory_space<vmem>>, vector<1x128x128xbf16>
    %134 = vector.shape_cast %133 : vector<1x128x128xbf16> to vector<128x128xbf16>
    %cst_100 = arith.constant dense<0.000000e+00> : vector<128x128xf32>
    %135 = tpu.matmul %132, %134, %cst_100 {dimension_numbers = #tpu.dot_dimension_numbers<[1], [0], [0], [1], [0, 0, 1, 1], [], []>} : vector<128x128xbf16>, vector<128x128xbf16>, vector<128x128xf32> -> vector<128x128xf32>
    %c8_101 = arith.constant 8 : index
    %c0_102 = arith.constant 0 : index
    %c0_103 = arith.constant 0 : index
    %136 = vector.load %arg7[%c8_101, %c0_102, %c0_103] : memref<10x1x128xf32, #tpu.memory_space<vmem>>, vector<1x1x128xf32>
    %137 = vector.shape_cast %136 : vector<1x1x128xf32> to vector<1x128xf32>
    %138 = vector.broadcast %137 : vector<1x128xf32> to vector<128x128xf32>
    %139 = arith.addf %135, %138 : vector<128x128xf32>
    %cst_104 = arith.constant 0.000000e+00 : f32
    %140 = vector.broadcast %cst_104 : f32 to vector<128x128xf32>
    %141 = arith.maximumf %139, %140 : vector<128x128xf32>
    %142 = arith.truncf %141 : vector<128x128xf32> to vector<128x128xbf16>
    %c9 = arith.constant 9 : index
    %c0_105 = arith.constant 0 : index
    %c0_106 = arith.constant 0 : index
    %143 = vector.load %arg6[%c9, %c0_105, %c0_106] : memref<10x128x128xbf16, #tpu.memory_space<vmem>>, vector<1x128x128xbf16>
    %144 = vector.shape_cast %143 : vector<1x128x128xbf16> to vector<128x128xbf16>
    %cst_107 = arith.constant dense<0.000000e+00> : vector<128x128xf32>
    %145 = tpu.matmul %142, %144, %cst_107 {dimension_numbers = #tpu.dot_dimension_numbers<[1], [0], [0], [1], [0, 0, 1, 1], [], []>} : vector<128x128xbf16>, vector<128x128xbf16>, vector<128x128xf32> -> vector<128x128xf32>
    %c9_108 = arith.constant 9 : index
    %c0_109 = arith.constant 0 : index
    %c0_110 = arith.constant 0 : index
    %146 = vector.load %arg7[%c9_108, %c0_109, %c0_110] : memref<10x1x128xf32, #tpu.memory_space<vmem>>, vector<1x1x128xf32>
    %147 = vector.shape_cast %146 : vector<1x1x128xf32> to vector<1x128xf32>
    %148 = vector.broadcast %147 : vector<1x128xf32> to vector<128x128xf32>
    %149 = arith.addf %145, %148 : vector<128x128xf32>
    %150 = arith.addf %129, %149 : vector<128x128xf32>
    %cst_111 = arith.constant 0.000000e+00 : f32
    %151 = vector.broadcast %cst_111 : f32 to vector<128x128xf32>
    %152 = arith.maximumf %150, %151 : vector<128x128xf32>
    %153 = arith.truncf %152 : vector<128x128xf32> to vector<128x128xbf16>
    %c0_112 = arith.constant 0 : index
    %c0_113 = arith.constant 0 : index
    %154 = vector.load %arg8[%c0_112, %c0_113] : memref<128x4xbf16, #tpu.memory_space<vmem>>, vector<128x4xbf16>
    %cst_114 = arith.constant dense<0.000000e+00> : vector<128x4xf32>
    %155 = tpu.matmul %153, %154, %cst_114 {dimension_numbers = #tpu.dot_dimension_numbers<[1], [0], [0], [1], [0, 0, 1, 1], [], []>} : vector<128x128xbf16>, vector<128x4xbf16>, vector<128x4xf32> -> vector<128x4xf32>
    %c0_115 = arith.constant 0 : index
    %c0_116 = arith.constant 0 : index
    %156 = vector.load %arg9[%c0_115, %c0_116] : memref<1x4xf32, #tpu.memory_space<vmem>>, vector<1x4xf32>
    %157 = vector.broadcast %156 : vector<1x4xf32> to vector<128x4xf32>
    %158 = arith.addf %155, %157 : vector<128x4xf32>
    %c0_117 = arith.constant 0 : index
    %c0_118 = arith.constant 0 : index
    %159 = vector.load %arg10[%c0_117, %c0_118] : memref<128x4xf32, #tpu.memory_space<vmem>>, vector<128x4xf32>
    tpu.vector_store %arg10[%c0_117, %c0_118], %158 {strides = array<i32>} : memref<128x4xf32, #tpu.memory_space<vmem>>, vector<128x4xf32>,
    return
  }
  func.func @transform_0(%arg0: i32) -> (i32, i32) {
    %c0_i32 = arith.constant 0 : i32
    %c0_i32_0 = arith.constant 0 : i32
    return %arg0, %c0_i32 : i32, i32
  }
  func.func @transform_1(%arg0: i32) -> (i32, i32) {
    %c0_i32 = arith.constant 0 : i32
    %c0_i32_0 = arith.constant 0 : i32
    %c0_i32_1 = arith.constant 0 : i32
    return %c0_i32, %c0_i32_0 : i32, i32
  }
  func.func @transform_2(%arg0: i32) -> (i32, i32) {
    %c0_i32 = arith.constant 0 : i32
    %c0_i32_0 = arith.constant 0 : i32
    %c0_i32_1 = arith.constant 0 : i32
    return %c0_i32, %c0_i32_0 : i32, i32
  }
  func.func @transform_3(%arg0: i32) -> (i32, i32, i32) {
    %c0_i32 = arith.constant 0 : i32
    %c0_i32_0 = arith.constant 0 : i32
    %c0_i32_1 = arith.constant 0 : i32
    %c0_i32_2 = arith.constant 0 : i32
    return %c0_i32, %c0_i32_0, %c0_i32_1 : i32, i32, i32
  }
  func.func @transform_4(%arg0: i32) -> (i32, i32, i32) {
    %c0_i32 = arith.constant 0 : i32
    %c0_i32_0 = arith.constant 0 : i32
    %c0_i32_1 = arith.constant 0 : i32
    %c0_i32_2 = arith.constant 0 : i32
    return %c0_i32, %c0_i32_0, %c0_i32_1 : i32, i32, i32
  }
  func.func @transform_5(%arg0: i32) -> (i32, i32, i32) {
    %c0_i32 = arith.constant 0 : i32
    %c0_i32_0 = arith.constant 0 : i32
    %c0_i32_1 = arith.constant 0 : i32
    %c0_i32_2 = arith.constant 0 : i32
    return %c0_i32, %c0_i32_0, %c0_i32_1 : i32, i32, i32
  }
  func.func @transform_6(%arg0: i32) -> (i32, i32, i32) {
    %c0_i32 = arith.constant 0 : i32
    %c0_i32_0 = arith.constant 0 : i32
    %c0_i32_1 = arith.constant 0 : i32
    %c0_i32_2 = arith.constant 0 : i32
    return %c0_i32, %c0_i32_0, %c0_i32_1 : i32, i32, i32
  }
  func.func @transform_7(%arg0: i32) -> (i32, i32) {
    %c0_i32 = arith.constant 0 : i32
    %c0_i32_0 = arith.constant 0 : i32
    %c0_i32_1 = arith.constant 0 : i32
    return %c0_i32, %c0_i32_0 : i32, i32
  }
  func.func @transform_8(%arg0: i32) -> (i32, i32) {
    %c0_i32 = arith.constant 0 : i32
    %c0_i32_0 = arith.constant 0 : i32
    %c0_i32_1 = arith.constant 0 : i32
    return %c0_i32, %c0_i32_0 : i32, i32
  }
  func.func @transform_9(%arg0: i32) -> (i32, i32) {
    %c0_i32 = arith.constant 0 : i32
    %c0_i32_0 = arith.constant 0 : i32
    return %arg0, %c0_i32 : i32, i32
  }
}

</mosaic_0001>

<bundles_post_ra>
// kernel: resnetfc_forward.1
= control target key start
LH: loop header
LB: loop body
LE: loop exit
PB: predicated region body
PF: predicated region fallthrough
CT: control target
= control target key end

     0   :  { %14 = vsyncpa [#allocation3], 0  ;;  %s5548_s30 = smov 0   ;;  %s6994_s0 = inlined_call_operand.vmem [shape: bf16[256,128], index: 0, kind: input, shape index: {}]   ;;  %s6995_s1 = inlined_call_operand.vmem [shape: bf16[128,128], index: 1, kind: input, shape index: {}]   ;;  %s6996_s2 = inlined_call_operand.vmem [shape: f32[1,128], index: 2, kind: input, shape index: {}]   ;;  %s6997_s3 = inlined_call_operand.hbm [shape: bf16[5,128,128], index: 3, kind: input, shape index: {}]   ;;  %s6998_s4 = inlined_call_operand.vmem [shape: f32[5,1,128], index: 4, kind: input, shape index: {}]   ;;  %s6999_s5 = inlined_call_operand.vmem [shape: bf16[10,128,128], index: 5, kind: input, shape index: {}]   ;;  %s7000_s6 = inlined_call_operand.vmem [shape: f32[10,1,128], index: 6, kind: input, shape index: {}]   ;;  %s7001_s7 = inlined_call_operand.vmem [shape: bf16[128,4], index: 7, kind: input, shape index: {}]   ;;  %s7002_s8 = inlined_call_operand.vmem [shape: f32[1,4], index: 8, kind: input, shape index: {}]   ;;  %s7003_s9 = inlined_call_operand.vmem [shape: f32[256,4], index: 9, kind: output, shape index: {}]  }
   0x1 LB: > { %s3807_s10 = sadd.s32 4294967295, %s5493_s30   ;;  %p3809_p0 = scmp.ge.s32.totalorder %s5493_s30, 1  ;;  %s5493_s30 = sphi %s5548_s30, %s20_s30  }
   0x2   : > { %p245_p1 = scmp.lt.s32.totalorder %s5493_s30, 3  ;;  %s5495_s11 = smov [#allocation2]  }
   0x3   : > { %s263_s12 = sshll.u32 %s5495_s11, 4  ;;  %p5562_p3 = scmp.eq.s32.totalorder %s3807_s10, 0  ;;  %s264_s12 = int_to_ptr.vmem [resolvable:$true] %s263_s12 }
   0x4   : > { %p5556_p2 = pnand %p3809_p0, %p245_p1  ;;  %s5455_s18 = scalar_lea.hbm %s6997_s3, 5120 }
   0x5   : > { %s7008_s14 = scalar_select %p5562_p3, 1, 0 }
   0x6   : > { %s7007_s13 = scalar_select %p5556_p2, 1, 0 }
   0x7   : > { %p5278_p4 = pneg %p5556_p2  ;;  %p5456_p6 = scmp.ne.s32.totalorder %s6997_s3, %s5455_s18 }
   0x8   : > { %p5462_p10 = scmp.lt.u32.totalorder %s5455_s18, %s6997_s3 }
   0x9   : > { %p5570_p5 = pnand %p5562_p3, %p5278_p4 }
   0xb   : > { %p5457_p7 = pneg %p5570_p5 }
   0xd   : > { %p5458_p8 = pnand %p5457_p7, %p5456_p6 }
   0xf   : > { %p5459_p9 = pneg %p5458_p8 }
  0x11   : > { %p5464_p11 = pnand %p5462_p10, %p5459_p9 }
  0x13   : > { %5467 = shalt.err (!%p5464_p11)
}
  0x14   : > { %s5468_s23 = scalar_lea.vmem %s264_s12, 5120  ;;  %p5476_p1 = scmp.lt.s32.totalorder %s264_s12, %s264_s12 }
  0x15   : > { %p5469_p12 = scmp.ne.s32.totalorder %s264_s12, %s5468_s23  ;;  %p5477_p4 = scmp.lt.s32.totalorder %s5468_s23, %s5468_s23 }
  0x17   : > { %p5471_p13 = pnand %p5469_p12, %p5457_p7  ;;  %p5478_p3 = por %p5477_p4, %p5476_p1 }
  0x19   : > { %p5472_p0 = pneg %p5471_p13 }
  0x1b   : > { %p5479_p2 = pnand %p5478_p3, %p5472_p0 }
  0x1d   : > { %5482 = shalt.err (!%p5479_p2)
}
  0x1e   : > { %s5496_s24 = smov 64   ;;  %s5497_s25 = smov 4  }
  0x1f   : > { %5281 = dma.hbm_to_vmem [thread:$0]  (!%p5570_p5), %s6997_s3, 5120, %s264_s12, [#allocation3], %s5496_s24, %s5496_s24, %s5497_s25  }
  0x20   : > { %p7010_p6 = scmp.ne.s32.totalorder %s7007_s13, 0 }
  0x21   : > { %p7011_p8 = scmp.ne.s32.totalorder (!%p7010_p6), %s7008_s14, 0 }
  0x22   : > { %303 = sbr.rel (%p7010_p6) target bundleno = 2921 (0xb69), region = 56 }
  0x29   : > { %5488 = dma.done.wait (%p7011_p8), [#allocation3], 5120  }
  0x2a   : > { %5490 = vsyncadd (%p7011_p8), [#allocation3], 4294962176  ;;  %s3814_s28 = sshll.u32 %s3807_s10, 4  ;;  %v5295_v0 = vld [vmem:[%s6995_s1] sm:$0xff]   ;;  %v5296_v1 = vld [vmem:[%s6995_s1 + $0x8] sm:$0xff]   ;;  %vm3722_vm0 = vcmask 31744  }
  0x2b   : > { %p340_p2 = scmp.lt.s32.totalorder %s3814_s28, 31  ;;  %4410 = vmatprep.subr.bf16.mxu0 %v5295_v0  ;;  %v5297_v2 = vld [vmem:[%s6995_s1 + $0x10] sm:$0xff]   ;;  %v5298_v3 = vld [vmem:[%s6995_s1 + $0x18] sm:$0xff]   ;;  %v5299_v5 = vld [vmem:[%s6995_s1 + $0x20] sm:$0xff]  }
  0x2c   : > { %4411 = vmatpush3.bf16.msra.mxu0 %v5295_v0  ;;  %v5300_v6 = vld [vmem:[%s6995_s1 + $0x28] sm:$0xff]   ;;  %v5301_v7 = vld [vmem:[%s6995_s1 + $0x30] sm:$0xff]   ;;  %v5302_v8 = vld [vmem:[%s6995_s1 + $0x38] sm:$0xff]  }
  0x2d   : > { %s7013_s28 = smov (!%p340_p2, %s3814_s28), 31  ;;  %4412 = vmatprep.subr.bf16.mxu0 %v5296_v1  ;;  %v5319_v9 = vld [vmem:[%s6999_s5] sm:$0xff]   ;;  %v5320_v10 = vld [vmem:[%s6999_s5 + $0x8] sm:$0xff]   ;;  %v5321_v12 = vld [vmem:[%s6999_s5 + $0x10] sm:$0xff]  }
  0x2e   : > { %s3815_s15 = sshll.u32 %s7013_s28, 2  ;;  %4474 = vmatprep.subr.bf16.mxu1 %v5319_v9  ;;  %v5305_v11 = vld [vmem:[#allocation2] sm:$0xff]   ;;  %v5306_v14 = vld [vmem:[#allocation2 + $0x8] sm:$0xff]   ;;  %v5322_v16 = vld [vmem:[%s6999_s5 + $0x18] sm:$0xff]   ;;  %s3817_s19 = sshll.u32 %s7013_s28, 3 }
  0x2f   : > { %s5613_s18 = scalar_lea.vmem %s6994_s0, %s3815_s15  ;;  %4475 = vmatpush3.bf16.msra.mxu1 %v5319_v9  ;;  %v5309_v17 = vld [vmem:[#allocation2 + $0x10] sm:$0xff]   ;;  %v5323_v18 = vld [vmem:[%s6999_s5 + $0x20] sm:$0xff]   ;;  %v5310_v21 = vld [vmem:[#allocation2 + $0x18] sm:$0xff]   ;;  %s6957_s23 = scalar_lea.vmem %s7003_s9, %s3817_s19 }
  0x30   : > { %4413 = vmatpush3.bf16.msra.mxu0 %v5296_v1  ;;  %v5619_v4 = vld [vmem:[%s5613_s18] sm:$0xff]   ;;  %4476 = vmatprep.subr.bf16.mxu1 %v5320_v10  ;;  %v5644_v13 = vld [vmem:[%s5613_s18 + $0x8] sm:$0xff]   ;;  %v5647_v15 = vld [vmem:[%s5613_s18 + $0x10] sm:$0xff]  }
  0x31   : > { %4414 = vmatprep.subr.bf16.mxu0 %v5297_v2  ;;  %4426 = vmatprep.mubr.bf16.mxu0 %v5619_v4  ;;  %v5658_v19 = vld [vmem:[%s5613_s18 + $0x18] sm:$0xff]   ;;  %v5661_v20 = vld [vmem:[%s5613_s18 + $0x20] sm:$0xff]   ;;  %v5324_v22 = vld [vmem:[%s6999_s5 + $0x28] sm:$0xff]  }
  0x32   : > { %v5313_v23 = vld [vmem:[#allocation2 + $0x20] sm:$0xff]   ;;  %v5669_v24 = vld [vmem:[%s5613_s18 + $0x28] sm:$0xff]   ;;  %v5672_v25 = vld [vmem:[%s5613_s18 + $0x30] sm:$0xff]  }
  0x33   : > { %4477 = vmatpush3.bf16.msra.mxu1 %v5320_v10  ;;  %v5314_v26 = vld [vmem:[#allocation2 + $0x28] sm:$0xff]   ;;  %v5317_v27 = vld [vmem:[#allocation2 + $0x30] sm:$0xff]   ;;  %v5677_v28 = vld [vmem:[%s5613_s18 + $0x38] sm:$0xff]  }
  0x34   : > { %4415 = vmatpush3.bf16.msra.mxu0 %v5297_v2  ;;  %4478 = vmatprep.subr.bf16.mxu1 %v5321_v12  ;;  %v5318_v29 = vld [vmem:[#allocation2 + $0x38] sm:$0xff]   ;;  %v5325_v30 = vld [vmem:[%s6999_s5 + $0x30] sm:$0xff]   ;;  %v5327_v32 = vld [vmem:[%s6999_s5 + $0x40] sm:$0xff]  }
  0x35   : > { %4416 = vmatprep.subr.bf16.mxu0 %v5298_v3  ;;  %v5326_v31 = vld [vmem:[%s6999_s5 + $0x38] sm:$0xff]   ;;  %v5700_v33 = vld [vmem:[%s6996_s2] ss:$0 sm:$0xff]  ;;  %v5328_v54 = vld [vmem:[%s6999_s5 + $0x48] sm:$0xff]  }
  0x36   : > { %v5705_v34 = vld [vmem:[%s6998_s4] ss:$0 sm:$0xff]  ;;  %v5329_v61 = vld [vmem:[%s6999_s5 + $0x50] sm:$0xff]  }
  0x37   : > { %4479 = vmatpush3.bf16.msra.mxu1 %v5321_v12  ;;  %v5709_v35 = vadd.f32 %v5705_v34, %v5700_v33 }
  0x38   : > { %4417 = vmatpush3.bf16.msra.mxu0 %v5298_v3  ;;  %4480 = vmatprep.subr.bf16.mxu1 %v5322_v16 }
  0x39   : > { %4418 = vmatprep.subr.bf16.mxu0 %v5299_v5 }
  0x3b   : > { %4481 = vmatpush3.bf16.msra.mxu1 %v5322_v16 }
  0x3c   : > { %4419 = vmatpush3.bf16.msra.mxu0 %v5299_v5  ;;  %4482 = vmatprep.subr.bf16.mxu1 %v5323_v18 }
  0x3d   : > { %4420 = vmatprep.subr.bf16.mxu0 %v5300_v6 }
  0x3f   : > { %4483 = vmatpush3.bf16.msra.mxu1 %v5323_v18 }
  0x40   : > { %4421 = vmatpush3.bf16.msra.mxu0 %v5300_v6  ;;  %4484 = vmatprep.subr.bf16.mxu1 %v5324_v22 }
  0x41   : > { %4422 = vmatprep.subr.bf16.mxu0 %v5301_v7 }
  0x43   : > { %4485 = vmatpush3.bf16.msra.mxu1 %v5324_v22 }
  0x44   : > { %4423 = vmatpush3.bf16.msra.mxu0 %v5301_v7  ;;  %4486 = vmatprep.subr.bf16.mxu1 %v5325_v30 }
  0x45   : > { %4424 = vmatprep.subr.bf16.mxu0 %v5302_v8 }
  0x47   : > { %4487 = vmatpush3.bf16.msra.mxu1 %v5325_v30 }
  0x48   : > { %4425 = vmatpush3.bf16.msra.mxu0 %v5302_v8  ;;  %4488 = vmatprep.subr.bf16.mxu1 %v5326_v31  ;;  %v5330_v8 = vld [vmem:[%s6999_s5 + $0x58] sm:$0xff]  }
  0x49   : > { %4442 = vmatprep.subr.bf16.mxu0 %v5305_v11 }
  0x4b   : > { %4427 = vmatmul.mubr.bf16.vlgmr.msra.gmra.mrb[0].mxu0 %v5644_v13  ;;  %4489 = vmatpush3.bf16.msra.mxu1 %v5326_v31  ;;  %v5332_v31 = vld [vmem:[%s6999_s5 + $0x68] sm:$0xff]  }
  0x4c   : > { %4443 = vmatpush3.bf16.msra.mxu0 %v5305_v11  ;;  %4430 = vmatprep.mubr.bf16.mxu0 %v5647_v15 }
  0x4d   : > { %4444 = vmatprep.subr.bf16.mxu0 %v5306_v14  ;;  %4506 = vmatprep.subr.bf16.mxu1 %v5327_v32 }
  0x50   : > { %4445 = vmatpush3.bf16.msra.mxu0 %v5306_v14 }
  0x51   : > { %4446 = vmatprep.subr.bf16.mxu0 %v5309_v17 }
  0x53   : > { %4431 = vmatmul.mubr.bf16.gmra.mrb[4].mxu0 %v5658_v19 }
  0x54   : > { %4447 = vmatpush3.bf16.msra.mxu0 %v5309_v17  ;;  %4434 = vmatprep.mubr.bf16.mxu0 %v5661_v20  ;;  %v5331_v17 = vld [vmem:[%s6999_s5 + $0x60] sm:$0xff]  }
  0x55   : > { %4448 = vmatprep.subr.bf16.mxu0 %v5310_v21 }
  0x58   : > { %4449 = vmatpush3.bf16.msra.mxu0 %v5310_v21 }
  0x59   : > { %4450 = vmatprep.subr.bf16.mxu0 %v5313_v23 }
  0x5b   : > { %4435 = vmatmul.mubr.bf16.gmra.mrb[8].mxu0 %v5669_v24 }
  0x5c   : > { %4451 = vmatpush3.bf16.msra.mxu0 %v5313_v23  ;;  %4438 = vmatprep.mubr.bf16.mxu0 %v5672_v25 }
  0x5d   : > { %4452 = vmatprep.subr.bf16.mxu0 %v5314_v26 }
  0x60   : > { %4453 = vmatpush3.bf16.msra.mxu0 %v5314_v26 }
  0x61   : > { %4454 = vmatprep.subr.bf16.mxu0 %v5317_v27 }
  0x63   : > { %4439 = vmatmul.mubr.bf16.gmra.mrb[12].mxu0 %v5677_v28 }
  0x64   : > { %4455 = vmatpush3.bf16.msra.mxu0 %v5317_v27  ;;  %4458 = vmatprep.mubr.bf16.mxu0 %v5619_v4 }
  0x65   : > { %4456 = vmatprep.subr.bf16.mxu0 %v5318_v29 }
  0x68   : > { %4457 = vmatpush3.bf16.msra.mxu0 %v5318_v29 }
  0x6b   : > { %4459 = vmatmul.mubr.bf16.vlgmr.msra.gmra.mrb[0].mxu0 %v5644_v13 }
  0x6c   : > { %4462 = vmatprep.mubr.bf16.mxu0 %v5647_v15 }
  0x73   : > { %4463 = vmatmul.mubr.bf16.gmra.mrb[4].mxu0 %v5658_v19 }
  0x74   : > { %4466 = vmatprep.mubr.bf16.mxu0 %v5661_v20 }
  0x7b   : > { %4467 = vmatmul.mubr.bf16.gmra.mrb[8].mxu0 %v5669_v24 }
  0x7c   : > { %4470 = vmatprep.mubr.bf16.mxu0 %v5672_v25 }
  0x83   : > { %4471 = vmatmul.mubr.bf16.gmra.mrb[12].mxu0 %v5677_v28 }
 0x13e   : > { %v5711_v36 = vpop.f32.mrb[0].mxu0 }
 0x13f   : > { %v4970_v37 = vadd.f32 %v5711_v36, %v5700_v33  ;;  %v5715_v38 = vpop.f32.mrb[1].mxu0 }
 0x140   : > { %v4972_v39 = vadd.f32 %v5700_v33, %v5715_v38  ;;  %v5719_v40 = vpop.f32.mrb[2].mxu0 }
 0x141   : > { %v5722_v41 = vadd.f32 %v4970_v37, %v5705_v34  ;;  %v5726_v42 = vadd.f32 %v5709_v35, %v5719_v40  ;;  %v5728_v43 = vpop.f32.mrb[3].mxu0 }
 0x142   : > { %v5731_v44 = vadd.f32 %v4972_v39, %v5705_v34  ;;  %v5735_v45 = vadd.f32 %v5709_v35, %v5728_v43 }
 0x143   : > { %v770_v46 = vmax.f32 %v5722_v41, 0.0  ;;  %v771_v47 = vmax.f32 %v5726_v42, 0.0 }
 0x144   : > { %v768_v48 = vmax.f32 %v5731_v44, 0.0  ;;  %v769_v49 = vmax.f32 %v5735_v45, 0.0 }
 0x145   : > { %v785_v50 = vpack.c.bf16 %v771_v47, %v770_v46 }
 0x146   : > { %v5741_v51 = vpop.f32.mrb[4].mxu0  ;;  %v784_v52 = vpack.c.bf16 %v769_v49, %v768_v48 }
 0x147   : > { %v5743_v53 = vpop.f32.mrb[5].mxu0  ;;  %v5750_v55 = vadd.f32 %v5709_v35, %v5741_v51 }
 0x148   : > { %v5752_v56 = vpop.f32.mrb[6].mxu0  ;;  %4490 = vmatprep.mubr.bf16.mxu1 %v784_v52  ;;  %v5756_v57 = vadd.f32 %v5709_v35, %v5743_v53 }
 0x149   : > { %v5758_v58 = vpop.f32.mrb[7].mxu0  ;;  %4491 = vmatmul.mubr.bf16.vlgmr.msra.gmra.mrb[0].mxu1 %v785_v50  ;;  %v5762_v59 = vadd.f32 %v5709_v35, %v5752_v56  ;;  %v774_v62 = vmax.f32 %v5750_v55, 0.0 }
 0x14a   : > { %4507 = vmatpush3.bf16.msra.mxu1 %v5327_v32  ;;  %v5766_v60 = vadd.f32 %v5709_v35, %v5758_v58  ;;  %v772_v0 = vmax.f32 %v5756_v57, 0.0 }
 0x14b   : > { %4508 = vmatprep.subr.bf16.mxu1 %v5328_v54  ;;  %v775_v63 = vmax.f32 %v5762_v59, 0.0 }
 0x14c   : > { %v773_v1 = vmax.f32 %v5766_v60, 0.0 }
 0x14d   : > { %v787_v3 = vpack.c.bf16 %v775_v63, %v774_v62  ;;  %v5335_v62 = vld [vmem:[#allocation2 + $0x40] sm:$0xff]  }
 0x14e   : > { %v5775_v2 = vpop.f32.mrb[8].mxu0  ;;  %4509 = vmatpush3.bf16.msra.mxu1 %v5328_v54  ;;  %v786_v5 = vpack.c.bf16 %v773_v1, %v772_v0  ;;  %v5343_v63 = vld [vmem:[%s6999_s5 + $0x80] sm:$0xff]   ;;  %v5344_v0 = vld [vmem:[%s6999_s5 + $0x88] sm:$0xff]   ;;  %v5345_v1 = vld [vmem:[%s6999_s5 + $0x90] sm:$0xff]  }
 0x14f   : > { %v5777_v4 = vpop.f32.mrb[9].mxu0  ;;  %4510 = vmatprep.subr.bf16.mxu1 %v5329_v61  ;;  %v5781_v6 = vadd.f32 %v5709_v35, %v5775_v2  ;;  %4570 = vmatprep.subr.bf16.mxu0 %v5343_v63 }
 0x150   : > { %v5783_v7 = vpop.f32.mrb[10].mxu0  ;;  %v5790_v9 = vadd.f32 %v5709_v35, %v5777_v4  ;;  %4494 = vmatprep.mubr.bf16.mxu1 %v786_v5  ;;  %4571 = vmatpush3.bf16.msra.mxu0 %v5343_v63  ;;  %v5347_v5 = vld [vmem:[%s6999_s5 + $0xa0] sm:$0xff]   ;;  %v5336_v63 = vld [vmem:[#allocation2 + $0x48] sm:$0xff]  }
 0x151   : > { %v5792_v10 = vpop.f32.mrb[11].mxu0  ;;  %v5796_v11 = vadd.f32 %v5709_v35, %v5783_v7  ;;  %4495 = vmatmul.mubr.bf16.gmra.mrb[4].mxu1 %v787_v3  ;;  %v778_v14 = vmax.f32 %v5781_v6, 0.0  ;;  %4572 = vmatprep.subr.bf16.mxu0 %v5344_v0  ;;  %v5346_v3 = vld [vmem:[%s6999_s5 + $0x98] sm:$0xff]  }
 0x152   : > { %v5800_v12 = vadd.f32 %v5709_v35, %v5792_v10  ;;  %4511 = vmatpush3.bf16.msra.mxu1 %v5329_v61  ;;  %v776_v18 = vmax.f32 %v5790_v9, 0.0  ;;  %v5334_v61 = vld [vmem:[%s6999_s5 + $0x78] sm:$0xff]  }
 0x153   : > { %v779_v16 = vmax.f32 %v5796_v11, 0.0  ;;  %4512 = vmatprep.subr.bf16.mxu1 %v5330_v8 }
 0x154   : > { %v777_v21 = vmax.f32 %v5800_v12, 0.0  ;;  %4573 = vmatpush3.bf16.msra.mxu0 %v5344_v0 }
 0x155   : > { %v789_v23 = vpack.c.bf16 %v779_v16, %v778_v14  ;;  %4574 = vmatprep.subr.bf16.mxu0 %v5345_v1  ;;  %v5867_v14 = vld [vmem:[%s7000_s6] ss:$0 sm:$0xff] }
 0x156   : > { %v5809_v22 = vpop.f32.mrb[12].mxu0  ;;  %v788_v27 = vpack.c.bf16 %v777_v21, %v776_v18  ;;  %4513 = vmatpush3.bf16.msra.mxu1 %v5330_v8  ;;  %v5348_v8 = vld [vmem:[%s6999_s5 + $0xa8] sm:$0xff]  }
 0x157   : > { %v5811_v26 = vpop.f32.mrb[13].mxu0  ;;  %v5815_v29 = vadd.f32 %v5709_v35, %v5809_v22  ;;  %4514 = vmatprep.subr.bf16.mxu1 %v5331_v17 }
 0x158   : > { %v5817_v30 = vpop.f32.mrb[14].mxu0  ;;  %v5824_v32 = vadd.f32 %v5709_v35, %v5811_v26  ;;  %4498 = vmatprep.mubr.bf16.mxu1 %v788_v27  ;;  %4575 = vmatpush3.bf16.msra.mxu0 %v5345_v1 }
 0x159   : > { %v5826_v37 = vpop.f32.mrb[15].mxu0  ;;  %v5830_v39 = vadd.f32 %v5709_v35, %v5817_v30  ;;  %4499 = vmatmul.mubr.bf16.gmra.mrb[8].mxu1 %v789_v23  ;;  %v782_v47 = vmax.f32 %v5815_v29, 0.0  ;;  %4576 = vmatprep.subr.bf16.mxu0 %v5346_v3 }
 0x15a   : > { %v5834_v46 = vadd.f32 %v5709_v35, %v5826_v37  ;;  %4515 = vmatpush3.bf16.msra.mxu1 %v5331_v17  ;;  %v780_v49 = vmax.f32 %v5824_v32, 0.0  ;;  %v5333_v35 = vld [vmem:[%s6999_s5 + $0x70] sm:$0xff]  }
 0x15b   : > { %v783_v48 = vmax.f32 %v5830_v39, 0.0  ;;  %4516 = vmatprep.subr.bf16.mxu1 %v5332_v31 }
 0x15c   : > { %v781_v50 = vmax.f32 %v5834_v46, 0.0  ;;  %4577 = vmatpush3.bf16.msra.mxu0 %v5346_v3 }
 0x15d   : > { %v791_v52 = vpack.c.bf16 %v783_v48, %v782_v47  ;;  %4578 = vmatprep.subr.bf16.mxu0 %v5347_v5 }
 0x15e   : > { %v790_v54 = vpack.c.bf16 %v781_v50, %v780_v49  ;;  %4517 = vmatpush3.bf16.msra.mxu1 %v5332_v31 }
 0x15f   : > { %4518 = vmatprep.subr.bf16.mxu1 %v5333_v35 }
 0x160   : > { %4502 = vmatprep.mubr.bf16.mxu1 %v790_v54  ;;  %4579 = vmatpush3.bf16.msra.mxu0 %v5347_v5 }
 0x161   : > { %4503 = vmatmul.mubr.bf16.gmra.mrb[12].mxu1 %v791_v52  ;;  %4580 = vmatprep.subr.bf16.mxu0 %v5348_v8 }
 0x162   : > { %4519 = vmatpush3.bf16.msra.mxu1 %v5333_v35 }
 0x163   : > { %4520 = vmatprep.subr.bf16.mxu1 %v5334_v61 }
 0x164   : > { %4581 = vmatpush3.bf16.msra.mxu0 %v5348_v8 }
 0x166   : > { %4521 = vmatpush3.bf16.msra.mxu1 %v5334_v61 }
 0x167   : > { %4538 = vmatprep.subr.bf16.mxu1 %v5335_v62 }
 0x21c   : > { %v4492_v16 = vpop.f32.mrb[0].mxu1 }
 0x21d   : > { %v906_v17 = vadd.f32 %v4492_v16, %v5867_v14  ;;  %v897_v18 = vpop.f32.mrb[1].mxu1 }
 0x21e   : > { %v898_v21 = vadd.f32 %v5867_v14, %v897_v18  ;;  %v4493_v23 = vpop.f32.mrb[2].mxu1  ;;  %v5337_v18 = vld [vmem:[#allocation2 + $0x50] sm:$0xff]  }
 0x21f   : > { %v909_v27 = vadd.f32 %v4493_v23, %v5867_v14  ;;  %v900_v31 = vpop.f32.mrb[3].mxu1  ;;  %v962_v48 = vmax.f32 %v906_v17, 0.0 }
 0x220   : > { %v901_v47 = vadd.f32 %v5867_v14, %v900_v31  ;;  %v960_v50 = vmax.f32 %v898_v21, 0.0 }
 0x221   : > { %v963_v49 = vmax.f32 %v909_v27, 0.0 }
 0x222   : > { %v961_v52 = vmax.f32 %v901_v47, 0.0 }
 0x223   : > { %v977_v54 = vpack.c.bf16 %v963_v49, %v962_v48 }
 0x224   : > { %v976_v35 = vpack.c.bf16 %v961_v52, %v960_v50  ;;  %v4496_v61 = vpop.f32.mrb[4].mxu1 }
 0x225   : > { %v922_v0 = vadd.f32 %v4496_v61, %v5867_v14  ;;  %v913_v1 = vpop.f32.mrb[5].mxu1 }
 0x226   : > { %4522 = vmatprep.mubr.bf16.mxu1 %v976_v35  ;;  %v914_v3 = vadd.f32 %v5867_v14, %v913_v1  ;;  %v4497_v5 = vpop.f32.mrb[6].mxu1 }
 0x227   : > { %4523 = vmatmul.mubr.bf16.vlgmr.msra.gmra.mrb[16].mxu1 %v977_v54  ;;  %v925_v8 = vadd.f32 %v4497_v5, %v5867_v14  ;;  %v916_v16 = vpop.f32.mrb[7].mxu1  ;;  %v966_v21 = vmax.f32 %v922_v0, 0.0  ;;  %v5338_v54 = vld [vmem:[#allocation2 + $0x58] sm:$0xff]   ;;  %v5339_v5 = vld [vmem:[#allocation2 + $0x60] sm:$0xff]  }
 0x228   : > { %4539 = vmatpush3.bf16.msra.mxu1 %v5335_v62  ;;  %v917_v17 = vadd.f32 %v5867_v14, %v916_v16  ;;  %v964_v27 = vmax.f32 %v914_v3, 0.0 }
 0x229   : > { %4540 = vmatprep.subr.bf16.mxu1 %v5336_v63  ;;  %v967_v23 = vmax.f32 %v925_v8, 0.0 }
 0x22a   : > { %v965_v31 = vmax.f32 %v917_v17, 0.0 }
 0x22b   : > { %v979_v47 = vpack.c.bf16 %v967_v23, %v966_v21 }
 0x22c   : > { %4541 = vmatpush3.bf16.msra.mxu1 %v5336_v63  ;;  %v978_v48 = vpack.c.bf16 %v965_v31, %v964_v27  ;;  %v4500_v49 = vpop.f32.mrb[8].mxu1 }
 0x22d   : > { %4542 = vmatprep.subr.bf16.mxu1 %v5337_v18  ;;  %v938_v50 = vadd.f32 %v4500_v49, %v5867_v14  ;;  %v929_v52 = vpop.f32.mrb[9].mxu1 }
 0x22e   : > { %v930_v35 = vadd.f32 %v5867_v14, %v929_v52  ;;  %v4501_v62 = vpop.f32.mrb[10].mxu1  ;;  %4526 = vmatprep.mubr.bf16.mxu1 %v978_v48  ;;  %v5340_v48 = vld [vmem:[#allocation2 + $0x68] sm:$0xff]  }
 0x22f   : > { %v941_v61 = vadd.f32 %v4501_v62, %v5867_v14  ;;  %v932_v1 = vpop.f32.mrb[11].mxu1  ;;  %4527 = vmatmul.mubr.bf16.gmra.mrb[20].mxu1 %v979_v47  ;;  %v970_v3 = vmax.f32 %v938_v50, 0.0 }
 0x230   : > { %v933_v0 = vadd.f32 %v5867_v14, %v932_v1  ;;  %4543 = vmatpush3.bf16.msra.mxu1 %v5337_v18  ;;  %v968_v8 = vmax.f32 %v930_v35, 0.0 }
 0x231   : > { %v971_v63 = vmax.f32 %v941_v61, 0.0  ;;  %4544 = vmatprep.subr.bf16.mxu1 %v5338_v54 }
 0x232   : > { %v969_v16 = vmax.f32 %v933_v0, 0.0 }
 0x233   : > { %v981_v17 = vpack.c.bf16 %v971_v63, %v970_v3  ;;  %v5342_v63 = vld [vmem:[#allocation2 + $0x78] sm:$0xff]  }
 0x234   : > { %v980_v21 = vpack.c.bf16 %v969_v16, %v968_v8  ;;  %v4504_v23 = vpop.f32.mrb[12].mxu1  ;;  %4545 = vmatpush3.bf16.msra.mxu1 %v5338_v54  ;;  %v5341_v54 = vld [vmem:[#allocation2 + $0x70] sm:$0xff]   ;;  %v5886_v8 = vld [vmem:[%s5613_s18] sm:$0xff]  }
 0x235   : > { %v954_v27 = vadd.f32 %v4504_v23, %v5867_v14  ;;  %v945_v31 = vpop.f32.mrb[13].mxu1  ;;  %4546 = vmatprep.subr.bf16.mxu1 %v5339_v5 }
 0x236   : > { %v946_v47 = vadd.f32 %v5867_v14, %v945_v31  ;;  %v4505_v49 = vpop.f32.mrb[14].mxu1  ;;  %4530 = vmatprep.mubr.bf16.mxu1 %v980_v21  ;;  %v717_v21 = vadd.f32 %v5752_v56, %v5705_v34 }
 0x237   : > { %v957_v18 = vadd.f32 %v4505_v49, %v5867_v14  ;;  %v948_v50 = vpop.f32.mrb[15].mxu1  ;;  %4531 = vmatmul.mubr.bf16.gmra.mrb[24].mxu1 %v981_v17  ;;  %v974_v35 = vmax.f32 %v954_v27, 0.0  ;;  %v5942_v27 = vld [vmem:[%s6998_s4 + $0x1] ss:$0 sm:$0xff] }
 0x238   : > { %v949_v52 = vadd.f32 %v5867_v14, %v948_v50  ;;  %4547 = vmatpush3.bf16.msra.mxu1 %v5339_v5  ;;  %v972_v61 = vmax.f32 %v946_v47, 0.0  ;;  %v5349_v14 = vld [vmem:[%s6999_s5 + $0xb0] sm:$0xff]   ;;  %v5922_v5 = vld [vmem:[%s7000_s6 + $0x1] ss:$0 sm:$0xff]  ;;  %v709_v47 = vadd.f32 %v5705_v34, %v5758_v58 }
 0x239   : > { %v975_v62 = vmax.f32 %v957_v18, 0.0  ;;  %4548 = vmatprep.subr.bf16.mxu1 %v5340_v48  ;;  %4582 = vmatprep.subr.bf16.mxu0 %v5349_v14 }
 0x23a   : > { %v973_v1 = vmax.f32 %v949_v52, 0.0  ;;  %4583 = vmatpush3.bf16.msra.mxu0 %v5349_v14 }
 0x23b   : > { %v983_v0 = vpack.c.bf16 %v975_v62, %v974_v35 }
 0x23c   : > { %v982_v3 = vpack.c.bf16 %v973_v1, %v972_v61  ;;  %4549 = vmatpush3.bf16.msra.mxu1 %v5340_v48 }
 0x23d   : > { %4550 = vmatprep.subr.bf16.mxu1 %v5341_v54 }
 0x23e   : > { %4534 = vmatprep.mubr.bf16.mxu1 %v982_v3 }
 0x23f   : > { %4535 = vmatmul.mubr.bf16.gmra.mrb[28].mxu1 %v983_v0 }
 0x240   : > { %4551 = vmatpush3.bf16.msra.mxu1 %v5341_v54  ;;  %4554 = vmatprep.mubr.bf16.mxu1 %v5886_v8 }
 0x241   : > { %4552 = vmatprep.subr.bf16.mxu1 %v5342_v63 }
 0x244   : > { %4553 = vmatpush3.bf16.msra.mxu1 %v5342_v63 }
 0x247   : > { %4555 = vmatmul.mubr.bf16.vlgmr.msra.gmra.mrb[16].mxu1 %v5644_v13  ;;  %v5350_v13 = vld [vmem:[%s6999_s5 + $0xb8] sm:$0xff]  }
 0x248   : > { %4558 = vmatprep.mubr.bf16.mxu1 %v5647_v15  ;;  %4584 = vmatprep.subr.bf16.mxu0 %v5350_v13  ;;  %v5905_v15 = vld [vmem:[%s6999_s5 + $0xc0] sm:$0xff]  }
 0x249   : > { %4585 = vmatpush3.bf16.msra.mxu0 %v5350_v13 }
 0x24a   : > { %4602 = vmatprep.subr.bf16.mxu0 %v5905_v15 }
 0x24f   : > { %4559 = vmatmul.mubr.bf16.gmra.mrb[20].mxu1 %v5658_v19  ;;  %v701_v19 = vadd.f32 %v5719_v40, %v5705_v34  ;;  %v690_v40 = vadd.f32 %v5705_v34, %v5715_v38 }
 0x250   : > { %4562 = vmatprep.mubr.bf16.mxu1 %v5661_v20  ;;  %v693_v20 = vadd.f32 %v5705_v34, %v5728_v43 }
 0x257   : > { %4563 = vmatmul.mubr.bf16.gmra.mrb[24].mxu1 %v5669_v24  ;;  %v5913_v24 = vadd.f32 nan, %v5700_v33  ;;  %v5929_v33 = vadd.f32 nan, %v5922_v5 }
 0x258   : > { %4566 = vmatprep.mubr.bf16.mxu1 %v5672_v25  ;;  %v714_v25 = vadd.f32 %v5741_v51, %v5705_v34 }
 0x259   : > { %v755_v16 = vadd.f32 %v701_v19, %v5913_v24  ;;  %v753_v43 = vadd.f32 %v693_v20, %v5913_v24  ;;  %v752_v23 = vadd.f32 %v690_v40, %v5913_v24  ;;  %v1157_v48 = vadd.f32 %v5726_v42, %v5929_v33 }
 0x25a   : > { %v758_v51 = vadd.f32 %v714_v25, %v5913_v24  ;;  %v1155_v49 = vadd.f32 %v5735_v45, %v5929_v33  ;;  %v759_v18 = vadd.f32 %v717_v21, %v5913_v24  ;;  %v1156_v50 = vadd.f32 %v5722_v41, %v5929_v33 }
 0x25b   : > { %v5008_v38 = vadd.f32 %v5922_v5, %v755_v16  ;;  %v5011_v31 = vadd.f32 %v5922_v5, %v753_v43  ;;  %v730_v42 = vadd.f32 %v5775_v2, %v5705_v34  ;;  %v1154_v35 = vadd.f32 %v5731_v44, %v5929_v33 }
 0x25c   : > { %v5014_v56 = vadd.f32 %v5922_v5, %v758_v51  ;;  %v5005_v58 = vadd.f32 %v5922_v5, %v752_v23  ;;  %v1160_v45 = vadd.f32 %v5750_v55, %v5929_v33  ;;  %v5967_v54 = vadd.f32 %v5756_v57, %v5929_v33 }
 0x25d   : > { %v5009_v62 = vadd.f32 %v5008_v38, %v5942_v27  ;;  %v5971_v41 = vadd.f32 %v5762_v59, %v5929_v33  ;;  %v5012_v2 = vadd.f32 %v5011_v31, %v5942_v27  ;;  %v757_v61 = vadd.f32 %v709_v47, %v5913_v24 }
 0x25e   : > { %v5977_v44 = vadd.f32 %v5766_v60, %v5929_v33  ;;  %v5015_v0 = vadd.f32 %v5014_v56, %v5942_v27  ;;  %v722_v57 = vadd.f32 %v5705_v34, %v5777_v4  ;;  %v5020_v14 = vadd.f32 %v5922_v5, %v759_v18 }
 0x25f   : > { %4567 = vmatmul.mubr.bf16.gmra.mrb[28].mxu1 %v5677_v28  ;;  %v698_v28 = vadd.f32 %v5711_v36, %v5705_v34  ;;  %v706_v36 = vadd.f32 %v5705_v34, %v5743_v53  ;;  %v762_v13 = vadd.f32 %v730_v42, %v5913_v24  ;;  %v733_v60 = vadd.f32 %v5783_v7, %v5705_v34 }
 0x260   : > { %v725_v21 = vadd.f32 %v5705_v34, %v5792_v10  ;;  %v5023_v18 = vadd.f32 %v5922_v5, %v757_v61 }
 0x261   : > { %v754_v17 = vadd.f32 %v698_v28, %v5913_v24  ;;  %v756_v53 = vadd.f32 %v706_v36, %v5913_v24 }
 0x262   : > { %v761_v61 = vadd.f32 %v725_v21, %v5913_v24 }
 0x263   : > { %v5002_v52 = vadd.f32 %v5922_v5, %v754_v17  ;;  %v5017_v55 = vadd.f32 %v5922_v5, %v756_v53 }
 0x265   : > { %v5018_v10 = vadd.f32 %v5017_v55, %v5942_v27  ;;  %v746_v55 = vadd.f32 %v5809_v22, %v5705_v34  ;;  %v738_v22 = vadd.f32 %v5705_v34, %v5811_v26  ;;  %v5353_v26 = vld [vmem:[%s6999_s5 + $0xd0] sm:$0xff]  }
 0x31a   : > { %v4556_v1 = vpop.f32.mrb[16].mxu1 }
 0x31b   : > { %v1286_v3 = vadd.f32 %v4556_v1, %v5942_v27  ;;  %v5003_v59 = vadd.f32 %v5002_v52, %v4556_v1  ;;  %v1277_v63 = vpop.f32.mrb[17].mxu1  ;;  %v763_v52 = vadd.f32 %v733_v60, %v5913_v24 }
 0x31c   : > { %v1278_v19 = vadd.f32 %v5942_v27, %v1277_v63  ;;  %v5006_v20 = vadd.f32 %v5005_v58, %v1277_v63  ;;  %v4557_v25 = vpop.f32.mrb[18].mxu1  ;;  %v5021_v58 = vadd.f32 %v5020_v14, %v5942_v27 }
 0x31d   : > { %v5989_v28 = vadd.f32 %v1286_v3, %v1156_v50  ;;  %v5992_v40 = vadd.f32 %v5003_v59, %v5942_v27  ;;  %v1289_v4 = vadd.f32 %v4557_v25, %v5942_v27  ;;  %v5995_v16 = vadd.f32 %v5009_v62, %v4557_v25  ;;  %v1280_v43 = vpop.f32.mrb[19].mxu1 }
 0x31e   : > { %v5997_v51 = vadd.f32 %v1278_v19, %v1154_v35  ;;  %v6000_v36 = vadd.f32 %v5006_v20, %v5942_v27  ;;  %v1281_v7 = vadd.f32 %v5942_v27, %v1280_v43  ;;  %v6003_v17 = vadd.f32 %v5012_v2, %v1280_v43 }
 0x31f   : > { %v1358_v23 = vmax.f32 %v5992_v40, 0.0  ;;  %v6008_v38 = vadd.f32 %v1289_v4, %v1157_v48  ;;  %v1359_v31 = vmax.f32 %v5995_v16, 0.0  ;;  %v760_v50 = vadd.f32 %v722_v57, %v5913_v24 }
 0x320   : > { %v1356_v53 = vmax.f32 %v6000_v36, 0.0  ;;  %v6012_v47 = vadd.f32 %v1281_v7, %v1155_v49  ;;  %v1357_v56 = vmax.f32 %v6003_v17, 0.0  ;;  %v1164_v48 = vadd.f32 %v5781_v6, %v5929_v33  ;;  %v5352_v6 = vld [vmem:[%s6999_s5 + $0xc8] sm:$0xff]  }
 0x321   : > { %v1373_v42 = vpack.c.bf16 %v1359_v31, %v1358_v23  ;;  %v5026_v49 = vadd.f32 %v5922_v5, %v762_v13  ;;  %v1162_v2 = vadd.f32 %v5790_v9, %v5929_v33  ;;  %v5024_v9 = vadd.f32 %v5023_v18, %v5942_v27 }
 0x322   : > { %v4560_v35 = vpop.f32.mrb[20].mxu1  ;;  %v1372_v62 = vpack.c.bf16 %v1357_v56, %v1356_v53  ;;  %v5029_v19 = vadd.f32 %v5922_v5, %v760_v50  ;;  %v5032_v20 = vadd.f32 %v5922_v5, %v763_v52  ;;  %v5035_v23 = vadd.f32 %v5922_v5, %v761_v61 }
 0x323   : > { %v1302_v1 = vadd.f32 %v4560_v35, %v5942_v27  ;;  %v6027_v57 = vadd.f32 %v5015_v0, %v4560_v35  ;;  %v1293_v3 = vpop.f32.mrb[21].mxu1  ;;  %v5027_v43 = vadd.f32 %v5026_v49, %v5942_v27  ;;  %v749_v31 = vadd.f32 %v5817_v30, %v5705_v34 }
 0x324   : > { %v1294_v59 = vadd.f32 %v5942_v27, %v1293_v3  ;;  %v6035_v63 = vadd.f32 %v5018_v10, %v1293_v3  ;;  %v4561_v14 = vpop.f32.mrb[22].mxu1  ;;  %4586 = vmatprep.mubr.bf16.mxu0 %v1372_v62  ;;  %v741_v53 = vadd.f32 %v5705_v34, %v5826_v37  ;;  %v1165_v52 = vadd.f32 %v5796_v11, %v5929_v33 }
 0x325   : > { %v6038_v13 = vadd.f32 %v1302_v1, %v1160_v45  ;;  %v1305_v0 = vadd.f32 %v4561_v14, %v5942_v27  ;;  %v1296_v60 = vpop.f32.mrb[23].mxu1  ;;  %4587 = vmatmul.mubr.bf16.vlgmr.msra.gmra.mrb[16].mxu0 %v1373_v42  ;;  %v6048_v4 = vadd.f32 %v5021_v58, %v4561_v14  ;;  %v764_v42 = vadd.f32 %v738_v22, %v5913_v24 }
 0x326   : > { %v6046_v25 = vadd.f32 %v1294_v59, %v5967_v54  ;;  %4603 = vmatpush3.bf16.msra.mxu0 %v5905_v15  ;;  %v1297_v7 = vadd.f32 %v5942_v27, %v1296_v60  ;;  %v6056_v21 = vadd.f32 %v5024_v9, %v1296_v60  ;;  %v766_v54 = vadd.f32 %v746_v55, %v5913_v24 }
 0x327   : > { %v6053_v45 = vadd.f32 %v1305_v0, %v5971_v41  ;;  %4604 = vmatprep.subr.bf16.mxu0 %v5352_v6  ;;  %v1362_v15 = vmax.f32 %v6027_v57, 0.0  ;;  %v1363_v41 = vmax.f32 %v6048_v4, 0.0  ;;  %v1360_v56 = vmax.f32 %v6035_v63, 0.0 }
 0x328   : > { %v6071_v18 = vadd.f32 %v1297_v7, %v5977_v44  ;;  %v1361_v50 = vmax.f32 %v6056_v21, 0.0  ;;  %v5030_v10 = vadd.f32 %v5029_v19, %v5942_v27  ;;  %v5033_v44 = vadd.f32 %v5032_v20, %v5942_v27 }
 0x329   : > { %v1375_v35 = vpack.c.bf16 %v1363_v41, %v1362_v15  ;;  %v767_v49 = vadd.f32 %v749_v31, %v5913_v24  ;;  %v5038_v3 = vadd.f32 %v5922_v5, %v766_v54  ;;  %v765_v55 = vadd.f32 %v741_v53, %v5913_v24 }
 0x32a   : > { %v4564_v30 = vpop.f32.mrb[24].mxu1  ;;  %4605 = vmatpush3.bf16.msra.mxu0 %v5352_v6  ;;  %v1374_v62 = vpack.c.bf16 %v1361_v50, %v1360_v56  ;;  %v5354_v6 = vld [vmem:[%s6999_s5 + $0xd8] sm:$0xff]   ;;  %v5036_v0 = vadd.f32 %v5035_v23, %v5942_v27  ;;  %v5041_v20 = vadd.f32 %v5922_v5, %v764_v42  ;;  %v1163_v22 = vadd.f32 %v5800_v12, %v5929_v33  ;;  %v5355_v12 = vld [vmem:[%s6999_s5 + $0xe0] sm:$0xff]  }
 0x32b   : > { %v1318_v58 = vadd.f32 %v4564_v30, %v5942_v27  ;;  %v6079_v34 = vadd.f32 %v5027_v43, %v4564_v30  ;;  %v1309_v37 = vpop.f32.mrb[25].mxu1  ;;  %4606 = vmatprep.subr.bf16.mxu0 %v5353_v26  ;;  %v5039_v23 = vadd.f32 %v5038_v3, %v5942_v27  ;;  %v5044_v54 = vadd.f32 %v5922_v5, %v767_v49 }
 0x32c   : > { %v1310_v11 = vadd.f32 %v5942_v27, %v1309_v37  ;;  %v6084_v61 = vadd.f32 %v5030_v10, %v1309_v37  ;;  %v4565_v1 = vpop.f32.mrb[26].mxu1  ;;  %4590 = vmatprep.mubr.bf16.mxu0 %v1374_v62  ;;  %v5042_v56 = vadd.f32 %v5041_v20, %v5942_v27  ;;  %v1169_v49 = vadd.f32 %v5830_v39, %v5929_v33 }
 0x32d   : > { %v6091_v59 = vadd.f32 %v1318_v58, %v1164_v48  ;;  %v1321_v14 = vadd.f32 %v4565_v1, %v5942_v27  ;;  %v1312_v9 = vpop.f32.mrb[27].mxu1  ;;  %v6097_v19 = vadd.f32 %v5033_v44, %v4565_v1  ;;  %4591 = vmatmul.mubr.bf16.gmra.mrb[20].mxu0 %v1375_v35  ;;  %v1366_v7 = vmax.f32 %v6079_v34, 0.0 }
 0x32e   : > { %v6095_v60 = vadd.f32 %v1310_v11, %v1162_v2  ;;  %v1313_v24 = vadd.f32 %v5942_v27, %v1312_v9  ;;  %v6105_v48 = vadd.f32 %v5036_v0, %v1312_v9  ;;  %4607 = vmatpush3.bf16.msra.mxu0 %v5353_v26  ;;  %v1364_v31 = vmax.f32 %v6084_v61, 0.0 }
 0x32f   : > { %v6102_v43 = vadd.f32 %v1321_v14, %v1165_v52  ;;  %v1367_v2 = vmax.f32 %v6097_v19, 0.0  ;;  %4608 = vmatprep.subr.bf16.mxu0 %v5354_v6  ;;  %v5047_v26 = vadd.f32 %v5922_v5, %v765_v55  ;;  %v1168_v52 = vadd.f32 %v5815_v29, %v5929_v33  ;;  %v5356_v29 = vld [vmem:[%s6999_s5 + $0xe8] sm:$0xff]  }
 0x330   : > { %v6115_v15 = vadd.f32 %v1313_v24, %v1163_v22  ;;  %v1365_v41 = vmax.f32 %v6105_v48, 0.0  ;;  %v1166_v58 = vadd.f32 %v5824_v32, %v5929_v33  ;;  %v5045_v62 = vadd.f32 %v5044_v54, %v5942_v27  ;;  %v5359_v54 = vld [vmem:[#allocation2 + $0x80] sm:$0xff]  }
 0x331   : > { %v1377_v50 = vpack.c.bf16 %v1367_v2, %v1366_v7  ;;  %v5048_v3 = vadd.f32 %v5047_v26, %v5942_v27  ;;  %v1167_v14 = vadd.f32 %v5834_v46, %v5929_v33  ;;  %v5357_v33 = vld [vmem:[%s6999_s5 + $0xf0] sm:$0xff]   ;;  %v5370_v26 = vld [vmem:[%s6999_s5 + $0x118] sm:$0xff]  }
 0x332   : > { %v4568_v53 = vpop.f32.mrb[28].mxu1  ;;  %v1376_v35 = vpack.c.bf16 %v1365_v41, %v1364_v31  ;;  %4609 = vmatpush3.bf16.msra.mxu0 %v5354_v6  ;;  %v5368_v31 = vld [vmem:[%s6999_s5 + $0x108] sm:$0xff]   ;;  %v5369_v41 = vld [vmem:[%s6999_s5 + $0x110] sm:$0xff]  }
 0x333   : > { %v1334_v42 = vadd.f32 %v4568_v53, %v5942_v27  ;;  %v6123_v30 = vadd.f32 %v5039_v23, %v4568_v53  ;;  %v1325_v10 = vpop.f32.mrb[29].mxu1  ;;  %4610 = vmatprep.subr.bf16.mxu0 %v5355_v12  ;;  %v5371_v53 = vld [vmem:[%s6999_s5 + $0x120] sm:$0xff]  }
 0x334   : > { %v1326_v37 = vadd.f32 %v5942_v27, %v1325_v10  ;;  %v6128_v5 = vadd.f32 %v5042_v56, %v1325_v10  ;;  %v4569_v44 = vpop.f32.mrb[30].mxu1  ;;  %4594 = vmatprep.mubr.bf16.mxu0 %v1376_v35  ;;  %v5372_v56 = vld [vmem:[%s6999_s5 + $0x128] sm:$0xff]  }
 0x335   : > { %v6136_v11 = vadd.f32 %v1334_v42, %v1168_v52  ;;  %v1337_v1 = vadd.f32 %v4569_v44, %v5942_v27  ;;  %v1328_v32 = vpop.f32.mrb[31].mxu1  ;;  %v6142_v55 = vadd.f32 %v5045_v62, %v4569_v44  ;;  %4595 = vmatmul.mubr.bf16.gmra.mrb[24].mxu0 %v1377_v50  ;;  %v1370_v20 = vmax.f32 %v6123_v30, 0.0  ;;  %v6184_v50 = vld [vmem:[%s7000_s6 + $0x2] ss:$0 sm:$0xff] }
 0x336   : > { %v6140_v6 = vadd.f32 %v1326_v37, %v1166_v58  ;;  %v1329_v39 = vadd.f32 %v5942_v27, %v1328_v32  ;;  %v6149_v0 = vadd.f32 %v5048_v3, %v1328_v32  ;;  %4611 = vmatpush3.bf16.msra.mxu0 %v5355_v12  ;;  %v1368_v24 = vmax.f32 %v6128_v5, 0.0  ;;  %v5358_v27 = vld [vmem:[%s6999_s5 + $0xf8] sm:$0xff]   ;;  %v5367_v12 = vld [vmem:[%s6999_s5 + $0x100] sm:$0xff]  }
 0x337   : > { %v6146_v9 = vadd.f32 %v1337_v1, %v1169_v49  ;;  %v1371_v22 = vmax.f32 %v6142_v55, 0.0  ;;  %4612 = vmatprep.subr.bf16.mxu0 %v5356_v29  ;;  %4666 = vmatprep.subr.bf16.mxu1 %v5367_v12 }
 0x338   : > { %v6154_v7 = vadd.f32 %v1329_v39, %v1167_v14  ;;  %v1369_v2 = vmax.f32 %v6149_v0, 0.0  ;;  %4667 = vmatpush3.bf16.msra.mxu1 %v5367_v12  ;;  %v5361_v12 = vld [vmem:[#allocation2 + $0x90] sm:$0xff]  }
 0x339   : > { %v1379_v23 = vpack.c.bf16 %v1371_v22, %v1370_v20  ;;  %4668 = vmatprep.subr.bf16.mxu1 %v5368_v31  ;;  %v5360_v20 = vld [vmem:[#allocation2 + $0x88] sm:$0xff]  }
 0x33a   : > { %v1378_v46 = vpack.c.bf16 %v1369_v2, %v1368_v24  ;;  %4613 = vmatpush3.bf16.msra.mxu0 %v5356_v29 }
 0x33b   : > { %4614 = vmatprep.subr.bf16.mxu0 %v5357_v33 }
 0x33c   : > { %4598 = vmatprep.mubr.bf16.mxu0 %v1378_v46  ;;  %4669 = vmatpush3.bf16.msra.mxu1 %v5368_v31 }
 0x33d   : > { %4599 = vmatmul.mubr.bf16.gmra.mrb[28].mxu0 %v1379_v23  ;;  %4670 = vmatprep.subr.bf16.mxu1 %v5369_v41 }
 0x33e   : > { %4615 = vmatpush3.bf16.msra.mxu0 %v5357_v33 }
 0x33f   : > { %4616 = vmatprep.subr.bf16.mxu0 %v5358_v27 }
 0x340   : > { %4671 = vmatpush3.bf16.msra.mxu1 %v5369_v41 }
 0x341   : > { %4672 = vmatprep.subr.bf16.mxu1 %v5370_v26 }
 0x342   : > { %4617 = vmatpush3.bf16.msra.mxu0 %v5358_v27 }
 0x343   : > { %4634 = vmatprep.subr.bf16.mxu0 %v5359_v54 }
 0x344   : > { %4673 = vmatpush3.bf16.msra.mxu1 %v5370_v26 }
 0x345   : > { %4674 = vmatprep.subr.bf16.mxu1 %v5371_v53 }
 0x348   : > { %4675 = vmatpush3.bf16.msra.mxu1 %v5371_v53 }
 0x349   : > { %4676 = vmatprep.subr.bf16.mxu1 %v5372_v56 }
 0x34c   : > { %4677 = vmatpush3.bf16.msra.mxu1 %v5372_v56 }
 0x3f8   : > { %v4588_v52 = vpop.f32.mrb[16].mxu0 }
 0x3f9   : > { %v1496_v42 = vadd.f32 %v4588_v52, %v6184_v50  ;;  %v1487_v10 = vpop.f32.mrb[17].mxu0 }
 0x3fa   : > { %v1488_v35 = vadd.f32 %v6184_v50, %v1487_v10  ;;  %v4589_v58 = vpop.f32.mrb[18].mxu0 }
 0x3fb   : > { %v1499_v37 = vadd.f32 %v4589_v58, %v6184_v50  ;;  %v1490_v44 = vpop.f32.mrb[19].mxu0  ;;  %v1552_v29 = vmax.f32 %v1496_v42, 0.0  ;;  %v5362_v58 = vld [vmem:[#allocation2 + $0x98] sm:$0xff]  }
 0x3fc   : > { %v1491_v62 = vadd.f32 %v6184_v50, %v1490_v44  ;;  %v1550_v1 = vmax.f32 %v1488_v35, 0.0 }
 0x3fd   : > { %v1553_v49 = vmax.f32 %v1499_v37, 0.0 }
 0x3fe   : > { %v1551_v32 = vmax.f32 %v1491_v62, 0.0 }
 0x3ff   : > { %v1567_v3 = vpack.c.bf16 %v1553_v49, %v1552_v29 }
 0x400   : > { %v1566_v14 = vpack.c.bf16 %v1551_v32, %v1550_v1  ;;  %v4592_v39 = vpop.f32.mrb[20].mxu0  ;;  %v5363_v32 = vld [vmem:[#allocation2 + $0xa0] sm:$0xff]  }
 0x401   : > { %v1512_v22 = vadd.f32 %v4592_v39, %v6184_v50  ;;  %v1503_v24 = vpop.f32.mrb[21].mxu0 }
 0x402   : > { %4618 = vmatprep.mubr.bf16.mxu0 %v1566_v14  ;;  %v1504_v2 = vadd.f32 %v6184_v50, %v1503_v24  ;;  %v4593_v23 = vpop.f32.mrb[22].mxu0 }
 0x403   : > { %4619 = vmatmul.mubr.bf16.vlgmr.msra.gmra.mrb[32].mxu0 %v1567_v3  ;;  %v1515_v46 = vadd.f32 %v4593_v23, %v6184_v50  ;;  %v1506_v33 = vpop.f32.mrb[23].mxu0  ;;  %v1556_v31 = vmax.f32 %v1512_v22, 0.0  ;;  %v5364_v23 = vld [vmem:[#allocation2 + $0xa8] sm:$0xff]  }
 0x404   : > { %4635 = vmatpush3.bf16.msra.mxu0 %v5359_v54  ;;  %v1507_v27 = vadd.f32 %v6184_v50, %v1506_v33  ;;  %v1554_v26 = vmax.f32 %v1504_v2, 0.0 }
 0x405   : > { %4636 = vmatprep.subr.bf16.mxu0 %v5360_v20  ;;  %v1557_v41 = vmax.f32 %v1515_v46, 0.0 }
 0x406   : > { %v1555_v53 = vmax.f32 %v1507_v27, 0.0 }
 0x407   : > { %v1569_v56 = vpack.c.bf16 %v1557_v41, %v1556_v31 }
 0x408   : > { %4637 = vmatpush3.bf16.msra.mxu0 %v5360_v20  ;;  %v1568_v52 = vpack.c.bf16 %v1555_v53, %v1554_v26  ;;  %v4596_v42 = vpop.f32.mrb[24].mxu0  ;;  %v5365_v53 = vld [vmem:[#allocation2 + $0xb0] sm:$0xff]  }
 0x409   : > { %4638 = vmatprep.subr.bf16.mxu0 %v5361_v12  ;;  %v1528_v10 = vadd.f32 %v4596_v42, %v6184_v50  ;;  %v1519_v35 = vpop.f32.mrb[25].mxu0 }
 0x40a   : > { %v1520_v37 = vadd.f32 %v6184_v50, %v1519_v35  ;;  %v4597_v54 = vpop.f32.mrb[26].mxu0  ;;  %4622 = vmatprep.mubr.bf16.mxu0 %v1568_v52  ;;  %v5366_v35 = vld [vmem:[#allocation2 + $0xb8] sm:$0xff]  }
 0x40b   : > { %v1531_v44 = vadd.f32 %v4597_v54, %v6184_v50  ;;  %v1522_v62 = vpop.f32.mrb[27].mxu0  ;;  %4623 = vmatmul.mubr.bf16.gmra.mrb[36].mxu0 %v1569_v56  ;;  %v1560_v49 = vmax.f32 %v1528_v10, 0.0  ;;  %v6216_v54 = vld [vmem:[%s5613_s18 + $0x20] sm:$0xff]  }
 0x40c   : > { %v1523_v29 = vadd.f32 %v6184_v50, %v1522_v62  ;;  %4639 = vmatpush3.bf16.msra.mxu0 %v5361_v12  ;;  %v1558_v3 = vmax.f32 %v1520_v37, 0.0  ;;  %v6212_v37 = vld [vmem:[%s5613_s18 + $0x18] sm:$0xff]  }
 0x40d   : > { %v1561_v1 = vmax.f32 %v1531_v44, 0.0  ;;  %4640 = vmatprep.subr.bf16.mxu0 %v5362_v58  ;;  %v6220_v44 = vld [vmem:[%s5613_s18 + $0x28] sm:$0xff]   ;;  %v6228_v62 = vld [vmem:[%s5613_s18 + $0x38] sm:$0xff]  }
 0x40e   : > { %v1559_v14 = vmax.f32 %v1523_v29, 0.0  ;;  %v5373_v29 = vld [vmem:[%s6999_s5 + $0x130] sm:$0xff]  }
 0x40f   : > { %v1571_v39 = vpack.c.bf16 %v1561_v1, %v1560_v49  ;;  %4678 = vmatprep.subr.bf16.mxu1 %v5373_v29  ;;  %v5374_v49 = vld [vmem:[%s6999_s5 + $0x138] sm:$0xff]   ;;  %v6240_v1 = vld [vmem:[%s6999_s5 + $0x140] sm:$0xff]  }
 0x410   : > { %v1570_v20 = vpack.c.bf16 %v1559_v14, %v1558_v3  ;;  %v4600_v22 = vpop.f32.mrb[28].mxu0  ;;  %4641 = vmatpush3.bf16.msra.mxu0 %v5362_v58  ;;  %v6208_v58 = vld [vmem:[%s5613_s18 + $0x10] sm:$0xff]   ;;  %4679 = vmatpush3.bf16.msra.mxu1 %v5373_v29 }
 0x411   : > { %v1544_v24 = vadd.f32 %v4600_v22, %v6184_v50  ;;  %v1535_v2 = vpop.f32.mrb[29].mxu0  ;;  %4642 = vmatprep.subr.bf16.mxu0 %v5363_v32  ;;  %4680 = vmatprep.subr.bf16.mxu1 %v5374_v49 }
 0x412   : > { %v1536_v46 = vadd.f32 %v6184_v50, %v1535_v2  ;;  %v4601_v33 = vpop.f32.mrb[30].mxu0  ;;  %4626 = vmatprep.mubr.bf16.mxu0 %v1570_v20  ;;  %v6258_v20 = vld [vmem:[%s6998_s4 + $0x2] ss:$0 sm:$0xff] }
 0x413   : > { %v1547_v27 = vadd.f32 %v4601_v33, %v6184_v50  ;;  %v1538_v12 = vpop.f32.mrb[31].mxu0  ;;  %4627 = vmatmul.mubr.bf16.gmra.mrb[40].mxu0 %v1571_v39  ;;  %v1564_v41 = vmax.f32 %v1544_v24, 0.0 }
 0x414   : > { %v1539_v31 = vadd.f32 %v6184_v50, %v1538_v12  ;;  %4643 = vmatpush3.bf16.msra.mxu0 %v5363_v32  ;;  %v1562_v56 = vmax.f32 %v1536_v46, 0.0  ;;  %v6204_v50 = vld [vmem:[%s5613_s18 + $0x8] sm:$0xff]   ;;  %4681 = vmatpush3.bf16.msra.mxu1 %v5374_v49  ;;  %v6246_v32 = vld [vmem:[%s7000_s6 + $0x3] ss:$0 sm:$0xff] }
 0x415   : > { %v1565_v26 = vmax.f32 %v1547_v27, 0.0  ;;  %4644 = vmatprep.subr.bf16.mxu0 %v5364_v23  ;;  %4698 = vmatprep.subr.bf16.mxu1 %v6240_v1  ;;  %v6249_v3 = vadd.f32 nan, %v6246_v32  ;;  %v5056_v14 = vadd.f32 %v6246_v32, %v6008_v38  ;;  %v5059_v39 = vadd.f32 %v6246_v32, %v6012_v47 }
 0x416   : > { %v1563_v52 = vmax.f32 %v1539_v31, 0.0  ;;  %v5050_v24 = vadd.f32 %v6246_v32, %v5989_v28  ;;  %v5053_v46 = vadd.f32 %v6246_v32, %v5997_v51 }
 0x417   : > { %v1573_v42 = vpack.c.bf16 %v1565_v26, %v1564_v41  ;;  %v1747_v22 = vadd.f32 %v5995_v16, %v6249_v3  ;;  %v1745_v2 = vadd.f32 %v6003_v17, %v6249_v3  ;;  %v1746_v38 = vadd.f32 %v5992_v40, %v6249_v3 }
 0x418   : > { %v1572_v10 = vpack.c.bf16 %v1563_v52, %v1562_v56  ;;  %4645 = vmatpush3.bf16.msra.mxu0 %v5364_v23  ;;  %v1744_v47 = vadd.f32 %v6000_v36, %v6249_v3  ;;  %v5057_v12 = vadd.f32 %v5056_v14, %v6258_v20  ;;  %v5060_v28 = vadd.f32 %v5059_v39, %v6258_v20 }
 0x419   : > { %4646 = vmatprep.subr.bf16.mxu0 %v5365_v53  ;;  %v5062_v40 = vadd.f32 %v6246_v32, %v6038_v13  ;;  %v5065_v36 = vadd.f32 %v6246_v32, %v6046_v25 }
 0x41a   : > { %4630 = vmatprep.mubr.bf16.mxu0 %v1572_v10 }
 0x41b   : > { %4631 = vmatmul.mubr.bf16.gmra.mrb[44].mxu0 %v1573_v42 }
 0x41c   : > { %4647 = vmatpush3.bf16.msra.mxu0 %v5365_v53  ;;  %4650 = vmatprep.mubr.bf16.mxu0 %v5886_v8  ;;  %v6224_v8 = vld [vmem:[%s5613_s18 + $0x30] sm:$0xff]  }
 0x41d   : > { %4648 = vmatprep.subr.bf16.mxu0 %v5366_v35 }
 0x420   : > { %4649 = vmatpush3.bf16.msra.mxu0 %v5366_v35 }
 0x423   : > { %4651 = vmatmul.mubr.bf16.vlgmr.msra.gmra.mrb[32].mxu0 %v6204_v50 }
 0x424   : > { %4654 = vmatprep.mubr.bf16.mxu0 %v6208_v58 }
 0x42b   : > { %4655 = vmatmul.mubr.bf16.gmra.mrb[36].mxu0 %v6212_v37 }
 0x42c   : > { %4658 = vmatprep.mubr.bf16.mxu0 %v6216_v54 }
 0x433   : > { %4659 = vmatmul.mubr.bf16.gmra.mrb[40].mxu0 %v6220_v44 }
 0x434   : > { %4662 = vmatprep.mubr.bf16.mxu0 %v6224_v8 }
 0x43b   : > { %4663 = vmatmul.mubr.bf16.gmra.mrb[44].mxu0 %v6228_v62 }
 0x4f6   : > { %v4652_v23 = vpop.f32.mrb[32].mxu0 }
 0x4f7   : > { %v1876_v33 = vadd.f32 %v4652_v23, %v6258_v20  ;;  %v5051_v27 = vadd.f32 %v5050_v24, %v4652_v23  ;;  %v1867_v16 = vpop.f32.mrb[33].mxu0 }
 0x4f8   : > { %v1868_v17 = vadd.f32 %v6258_v20, %v1867_v16  ;;  %v5054_v31 = vadd.f32 %v5053_v46, %v1867_v16  ;;  %v4653_v41 = vpop.f32.mrb[34].mxu0  ;;  %v5071_v46 = vadd.f32 %v6246_v32, %v6071_v18  ;;  %v1750_v16 = vadd.f32 %v6027_v57, %v6249_v3 }
 0x4f9   : > { %v6280_v26 = vadd.f32 %v1876_v33, %v1746_v38  ;;  %v6283_v51 = vadd.f32 %v5051_v27, %v6258_v20  ;;  %v1879_v53 = vadd.f32 %v4653_v41, %v6258_v20  ;;  %v6286_v56 = vadd.f32 %v5057_v12, %v4653_v41  ;;  %v1870_v52 = vpop.f32.mrb[35].mxu0 }
 0x4fa   : > { %v6288_v42 = vadd.f32 %v1868_v17, %v1744_v47  ;;  %v6291_v10 = vadd.f32 %v5054_v31, %v6258_v20  ;;  %v1871_v13 = vadd.f32 %v6258_v20, %v1870_v52  ;;  %v6294_v35 = vadd.f32 %v5060_v28, %v1870_v52  ;;  %v5376_v17 = vld [vmem:[%s6999_s5 + $0x148] sm:$0xff]  }
 0x4fb   : > { %v1948_v25 = vmax.f32 %v6283_v51, 0.0  ;;  %v6297_v29 = vadd.f32 %v1879_v53, %v1747_v22  ;;  %v1949_v49 = vmax.f32 %v6286_v56, 0.0  ;;  %v5068_v38 = vadd.f32 %v6246_v32, %v6053_v45 }
 0x4fc   : > { %v1946_v14 = vmax.f32 %v6291_v10, 0.0  ;;  %v6301_v39 = vadd.f32 %v1871_v13, %v1745_v2  ;;  %v1947_v24 = vmax.f32 %v6294_v35, 0.0  ;;  %v5063_v47 = vadd.f32 %v5062_v40, %v6258_v20 }
 0x4fd   : > { %v1963_v23 = vpack.c.bf16 %v1949_v49, %v1948_v25  ;;  %v5066_v22 = vadd.f32 %v5065_v36, %v6258_v20  ;;  %v1748_v2 = vadd.f32 %v6035_v63, %v6249_v3  ;;  %v5069_v40 = vadd.f32 %v5068_v38, %v6258_v20 }
 0x4fe   : > { %v4656_v33 = vpop.f32.mrb[36].mxu0  ;;  %v1962_v27 = vpack.c.bf16 %v1947_v24, %v1946_v14  ;;  %v5074_v57 = vadd.f32 %v6246_v32, %v6091_v59  ;;  %v1751_v63 = vadd.f32 %v6048_v4, %v6249_v3  ;;  %v5072_v13 = vadd.f32 %v5071_v46, %v6258_v20 }
 0x4ff   : > { %v1892_v12 = vadd.f32 %v4656_v33, %v6258_v20  ;;  %v6315_v28 = vadd.f32 %v5063_v47, %v4656_v33  ;;  %v1883_v45 = vpop.f32.mrb[37].mxu0  ;;  %v5077_v14 = vadd.f32 %v6246_v32, %v6095_v60  ;;  %v1749_v4 = vadd.f32 %v6056_v21, %v6249_v3 }
 0x500   : > { %v1884_v18 = vadd.f32 %v6258_v20, %v1883_v45  ;;  %v6321_v31 = vadd.f32 %v5066_v22, %v1883_v45  ;;  %v4657_v41 = vpop.f32.mrb[38].mxu0  ;;  %4682 = vmatprep.mubr.bf16.mxu1 %v1962_v27  ;;  %v5080_v21 = vadd.f32 %v6246_v32, %v6102_v43  ;;  %v5083_v27 = vadd.f32 %v6246_v32, %v6115_v15 }
 0x501   : > { %v6328_v36 = vadd.f32 %v1892_v12, %v1750_v16  ;;  %v1895_v53 = vadd.f32 %v4657_v41, %v6258_v20  ;;  %v1886_v52 = vpop.f32.mrb[39].mxu0  ;;  %4683 = vmatmul.mubr.bf16.vlgmr.msra.gmra.mrb[32].mxu1 %v1963_v23  ;;  %v6334_v49 = vadd.f32 %v5069_v40, %v4657_v41  ;;  %v5377_v23 = vld [vmem:[%s6999_s5 + $0x150] sm:$0xff]   ;;  %v1952_v47 = vmax.f32 %v6315_v28, 0.0 }
 0x502   : > { %v6332_v25 = vadd.f32 %v1884_v18, %v1748_v2  ;;  %4699 = vmatpush3.bf16.msra.mxu1 %v6240_v1  ;;  %v1887_v24 = vadd.f32 %v6258_v20, %v1886_v52  ;;  %v6344_v38 = vadd.f32 %v5072_v13, %v1886_v52  ;;  %v5075_v1 = vadd.f32 %v5074_v57, %v6258_v20 }
 0x503   : > { %v6341_v59 = vadd.f32 %v1895_v53, %v1751_v63  ;;  %4700 = vmatprep.subr.bf16.mxu1 %v5376_v17  ;;  %v1953_v60 = vmax.f32 %v6334_v49, 0.0  ;;  %v1950_v46 = vmax.f32 %v6321_v31, 0.0  ;;  %v1754_v16 = vadd.f32 %v6079_v34, %v6249_v3 }
 0x504   : > { %v6355_v33 = vadd.f32 %v1887_v24, %v1749_v4  ;;  %v1951_v22 = vmax.f32 %v6344_v38, 0.0  ;;  %v5078_v12 = vadd.f32 %v5077_v14, %v6258_v20  ;;  %v1752_v43 = vadd.f32 %v6084_v61, %v6249_v3  ;;  %v5378_v61 = vld [vmem:[%s6999_s5 + $0x158] sm:$0xff]  }
 0x505   : > { %v1965_v45 = vpack.c.bf16 %v1953_v60, %v1952_v47  ;;  %v5081_v53 = vadd.f32 %v5080_v21, %v6258_v20  ;;  %v1755_v52 = vadd.f32 %v6097_v19, %v6249_v3  ;;  %v5084_v24 = vadd.f32 %v5083_v27, %v6258_v20 }
 0x506   : > { %v4660_v2 = vpop.f32.mrb[40].mxu0  ;;  %4701 = vmatpush3.bf16.msra.mxu1 %v5376_v17  ;;  %v1964_v57 = vpack.c.bf16 %v1951_v22, %v1950_v46  ;;  %v5086_v17 = vadd.f32 %v6246_v32, %v6136_v11  ;;  %v5089_v11 = vadd.f32 %v6246_v32, %v6140_v6 }
 0x507   : > { %v1908_v18 = vadd.f32 %v4660_v2, %v6258_v20  ;;  %v6366_v41 = vadd.f32 %v5075_v1, %v4660_v2  ;;  %v1899_v40 = vpop.f32.mrb[41].mxu0  ;;  %4702 = vmatprep.subr.bf16.mxu1 %v5377_v23  ;;  %v1753_v1 = vadd.f32 %v6105_v48, %v6249_v3  ;;  %v5092_v2 = vadd.f32 %v6246_v32, %v6146_v9  ;;  %v5379_v48 = vld [vmem:[%s6999_s5 + $0x160] sm:$0xff]  }
 0x508   : > { %v1900_v15 = vadd.f32 %v6258_v20, %v1899_v40  ;;  %v6369_v63 = vadd.f32 %v5078_v12, %v1899_v40  ;;  %v4661_v34 = vpop.f32.mrb[42].mxu0  ;;  %4686 = vmatprep.mubr.bf16.mxu1 %v1964_v57  ;;  %v1758_v9 = vadd.f32 %v6123_v30, %v6249_v3  ;;  %v5380_v30 = vld [vmem:[%s6999_s5 + $0x168] sm:$0xff]  }
 0x509   : > { %v6379_v13 = vadd.f32 %v1908_v18, %v1754_v16  ;;  %v1911_v14 = vadd.f32 %v4661_v34, %v6258_v20  ;;  %v1902_v4 = vpop.f32.mrb[43].mxu0  ;;  %v6385_v60 = vadd.f32 %v5081_v53, %v4661_v34  ;;  %4687 = vmatmul.mubr.bf16.gmra.mrb[36].mxu1 %v1965_v45  ;;  %v1956_v22 = vmax.f32 %v6366_v41, 0.0 }
 0x50a   : > { %v6383_v47 = vadd.f32 %v1900_v15, %v1752_v43  ;;  %v1903_v21 = vadd.f32 %v6258_v20, %v1902_v4  ;;  %v6394_v46 = vadd.f32 %v5084_v24, %v1902_v4  ;;  %4703 = vmatpush3.bf16.msra.mxu1 %v5377_v23  ;;  %v5087_v16 = vadd.f32 %v5086_v17, %v6258_v20 }
 0x50b   : > { %v6391_v19 = vadd.f32 %v1911_v14, %v1755_v52  ;;  %v1957_v27 = vmax.f32 %v6385_v60, 0.0  ;;  %4704 = vmatprep.subr.bf16.mxu1 %v5378_v61  ;;  %v1954_v6 = vmax.f32 %v6369_v63, 0.0  ;;  %v5095_v45 = vadd.f32 %v6246_v32, %v6154_v7 }
 0x50c   : > { %v6405_v12 = vadd.f32 %v1903_v21, %v1753_v1  ;;  %v1955_v23 = vmax.f32 %v6394_v46, 0.0  ;;  %v5090_v18 = vadd.f32 %v5089_v11, %v6258_v20  ;;  %v1756_v17 = vadd.f32 %v6128_v5, %v6249_v3 }
 0x50d   : > { %v1967_v40 = vpack.c.bf16 %v1957_v27, %v1956_v22  ;;  %v5093_v14 = vadd.f32 %v5092_v2, %v6258_v20  ;;  %v1759_v4 = vadd.f32 %v6142_v55, %v6249_v3  ;;  %v5096_v11 = vadd.f32 %v5095_v45, %v6258_v20 }
 0x50e   : > { %v4664_v43 = vpop.f32.mrb[44].mxu0  ;;  %v1966_v53 = vpack.c.bf16 %v1955_v23, %v1954_v6  ;;  %4705 = vmatpush3.bf16.msra.mxu1 %v5378_v61  ;;  %v1757_v22 = vadd.f32 %v6149_v0, %v6249_v3  ;;  %v5381_v3 = vld [vmem:[%s6999_s5 + $0x170] sm:$0xff]  }
 0x50f   : > { %v1924_v57 = vadd.f32 %v4664_v43, %v6258_v20  ;;  %v6414_v15 = vadd.f32 %v5087_v16, %v4664_v43  ;;  %v1915_v34 = vpop.f32.mrb[45].mxu0  ;;  %4706 = vmatprep.subr.bf16.mxu1 %v5379_v48 }
 0x510   : > { %v1916_v52 = vadd.f32 %v6258_v20, %v1915_v34  ;;  %v6419_v7 = vadd.f32 %v5090_v18, %v1915_v34  ;;  %v4665_v32 = vpop.f32.mrb[46].mxu0  ;;  %4690 = vmatprep.mubr.bf16.mxu1 %v1966_v53  ;;  %v5394_v34 = vld [vmem:[%s6999_s5 + $0x198] sm:$0xff]   ;;  %v5395_v53 = vld [vmem:[%s6999_s5 + $0x1a0] sm:$0xff]  }
 0x511   : > { %v6427_v24 = vadd.f32 %v1924_v57, %v1758_v9  ;;  %v1927_v61 = vadd.f32 %v4665_v32, %v6258_v20  ;;  %v1918_v5 = vpop.f32.mrb[47].mxu0  ;;  %v6433_v21 = vadd.f32 %v5093_v14, %v4665_v32  ;;  %4691 = vmatmul.mubr.bf16.gmra.mrb[40].mxu1 %v1967_v40  ;;  %v1960_v2 = vmax.f32 %v6414_v15, 0.0  ;;  %v5391_v40 = vld [vmem:[%s6999_s5 + $0x180] sm:$0xff]   ;;  %v5392_v9 = vld [vmem:[%s6999_s5 + $0x188] sm:$0xff]   ;;  %v5393_v57 = vld [vmem:[%s6999_s5 + $0x190] sm:$0xff]  }
 0x512   : > { %v6431_v1 = vadd.f32 %v1916_v52, %v1756_v17  ;;  %v1919_v55 = vadd.f32 %v6258_v20, %v1918_v5  ;;  %v6440_v16 = vadd.f32 %v5096_v11, %v1918_v5  ;;  %4707 = vmatpush3.bf16.msra.mxu1 %v5379_v48  ;;  %v1958_v23 = vmax.f32 %v6419_v7, 0.0  ;;  %v5382_v20 = vld [vmem:[%s6999_s5 + $0x178] sm:$0xff]   ;;  %v5383_v48 = vld [vmem:[#allocation2 + $0xc0] sm:$0xff]   ;;  %4762 = vmatprep.subr.bf16.mxu0 %v5391_v40  ;;  %v5396_v17 = vld [vmem:[%s6999_s5 + $0x1a8] sm:$0xff]  }
 0x513   : > { %v6437_v27 = vadd.f32 %v1927_v61, %v1759_v4  ;;  %v1961_v6 = vmax.f32 %v6433_v21, 0.0  ;;  %4708 = vmatprep.subr.bf16.mxu1 %v5380_v30  ;;  %4763 = vmatpush3.bf16.msra.mxu0 %v5391_v40  ;;  %v6475_v52 = vld [vmem:[%s7000_s6 + $0x4] ss:$0 sm:$0xff] }
 0x514   : > { %v6445_v45 = vadd.f32 %v1919_v55, %v1757_v22  ;;  %v1959_v43 = vmax.f32 %v6440_v16, 0.0  ;;  %4764 = vmatprep.subr.bf16.mxu0 %v5392_v9 }
 0x515   : > { %v1969_v18 = vpack.c.bf16 %v1961_v6, %v1960_v2 }
 0x516   : > { %v1968_v0 = vpack.c.bf16 %v1959_v43, %v1958_v23  ;;  %4709 = vmatpush3.bf16.msra.mxu1 %v5380_v30 }
 0x517   : > { %4710 = vmatprep.subr.bf16.mxu1 %v5381_v3  ;;  %4765 = vmatpush3.bf16.msra.mxu0 %v5392_v9 }
 0x518   : > { %4694 = vmatprep.mubr.bf16.mxu1 %v1968_v0  ;;  %4766 = vmatprep.subr.bf16.mxu0 %v5393_v57 }
 0x519   : > { %4695 = vmatmul.mubr.bf16.gmra.mrb[44].mxu1 %v1969_v18 }
 0x51a   : > { %4711 = vmatpush3.bf16.msra.mxu1 %v5381_v3  ;;  %v5384_v3 = vld [vmem:[#allocation2 + $0xc8] sm:$0xff]  }
 0x51b   : > { %4712 = vmatprep.subr.bf16.mxu1 %v5382_v20  ;;  %4767 = vmatpush3.bf16.msra.mxu0 %v5393_v57 }
 0x51c   : > { %4768 = vmatprep.subr.bf16.mxu0 %v5394_v34 }
 0x51e   : > { %4713 = vmatpush3.bf16.msra.mxu1 %v5382_v20 }
 0x51f   : > { %4730 = vmatprep.subr.bf16.mxu1 %v5383_v48  ;;  %4769 = vmatpush3.bf16.msra.mxu0 %v5394_v34 }
 0x520   : > { %4770 = vmatprep.subr.bf16.mxu0 %v5395_v53 }
 0x523   : > { %4771 = vmatpush3.bf16.msra.mxu0 %v5395_v53 }
 0x524   : > { %4772 = vmatprep.subr.bf16.mxu0 %v5396_v17 }
 0x527   : > { %4773 = vmatpush3.bf16.msra.mxu0 %v5396_v17 }
 0x5d4   : > { %v4684_v32 = vpop.f32.mrb[32].mxu1 }
 0x5d5   : > { %v2086_v14 = vadd.f32 %v4684_v32, %v6475_v52  ;;  %v2077_v30 = vpop.f32.mrb[33].mxu1  ;;  %v5385_v32 = vld [vmem:[#allocation2 + $0xd0] sm:$0xff]  }
 0x5d6   : > { %v2078_v4 = vadd.f32 %v6475_v52, %v2077_v30  ;;  %v4685_v61 = vpop.f32.mrb[34].mxu1 }
 0x5d7   : > { %v2089_v5 = vadd.f32 %v4685_v61, %v6475_v52  ;;  %v2080_v11 = vpop.f32.mrb[35].mxu1  ;;  %v2142_v55 = vmax.f32 %v2086_v14, 0.0 }
 0x5d8   : > { %v2081_v22 = vadd.f32 %v6475_v52, %v2080_v11  ;;  %v2140_v6 = vmax.f32 %v2078_v4, 0.0 }
 0x5d9   : > { %v2143_v2 = vmax.f32 %v2089_v5, 0.0 }
 0x5da   : > { %v2141_v23 = vmax.f32 %v2081_v22, 0.0 }
 0x5db   : > { %v2157_v43 = vpack.c.bf16 %v2143_v2, %v2142_v55 }
 0x5dc   : > { %v2156_v18 = vpack.c.bf16 %v2141_v23, %v2140_v6  ;;  %v4688_v0 = vpop.f32.mrb[36].mxu1  ;;  %v5386_v6 = vld [vmem:[#allocation2 + $0xd8] sm:$0xff]  }
 0x5dd   : > { %v2102_v20 = vadd.f32 %v4688_v0, %v6475_v52  ;;  %v2093_v40 = vpop.f32.mrb[37].mxu1 }
 0x5de   : > { %4714 = vmatprep.mubr.bf16.mxu1 %v2156_v18  ;;  %v2094_v9 = vadd.f32 %v6475_v52, %v2093_v40  ;;  %v4689_v57 = vpop.f32.mrb[38].mxu1  ;;  %v5387_v40 = vld [vmem:[#allocation2 + $0xe0] sm:$0xff]  }
 0x5df   : > { %4715 = vmatmul.mubr.bf16.vlgmr.msra.gmra.mrb[48].mxu1 %v2157_v43  ;;  %v2105_v34 = vadd.f32 %v4689_v57, %v6475_v52  ;;  %v2096_v53 = vpop.f32.mrb[39].mxu1  ;;  %v2146_v14 = vmax.f32 %v2102_v20, 0.0 }
 0x5e0   : > { %4731 = vmatpush3.bf16.msra.mxu1 %v5383_v48  ;;  %v2097_v17 = vadd.f32 %v6475_v52, %v2096_v53  ;;  %v2144_v4 = vmax.f32 %v2094_v9, 0.0 }
 0x5e1   : > { %4732 = vmatprep.subr.bf16.mxu1 %v5384_v3  ;;  %v2147_v30 = vmax.f32 %v2105_v34, 0.0 }
 0x5e2   : > { %v2145_v61 = vmax.f32 %v2097_v17, 0.0 }
 0x5e3   : > { %v2159_v5 = vpack.c.bf16 %v2147_v30, %v2146_v14 }
 0x5e4   : > { %4733 = vmatpush3.bf16.msra.mxu1 %v5384_v3  ;;  %v2158_v11 = vpack.c.bf16 %v2145_v61, %v2144_v4  ;;  %v4692_v22 = vpop.f32.mrb[40].mxu1  ;;  %v5388_v4 = vld [vmem:[#allocation2 + $0xe8] sm:$0xff]  }
 0x5e5   : > { %4734 = vmatprep.subr.bf16.mxu1 %v5385_v32  ;;  %v2118_v55 = vadd.f32 %v4692_v22, %v6475_v52  ;;  %v2109_v2 = vpop.f32.mrb[41].mxu1 }
 0x5e6   : > { %v2110_v23 = vadd.f32 %v6475_v52, %v2109_v2  ;;  %v4693_v48 = vpop.f32.mrb[42].mxu1  ;;  %4718 = vmatprep.mubr.bf16.mxu1 %v2158_v11 }
 0x5e7   : > { %v2121_v43 = vadd.f32 %v4693_v48, %v6475_v52  ;;  %v2112_v18 = vpop.f32.mrb[43].mxu1  ;;  %4719 = vmatmul.mubr.bf16.gmra.mrb[52].mxu1 %v2159_v5  ;;  %v2150_v20 = vmax.f32 %v2118_v55, 0.0 }
 0x5e8   : > { %v2113_v0 = vadd.f32 %v6475_v52, %v2112_v18  ;;  %4735 = vmatpush3.bf16.msra.mxu1 %v5385_v32  ;;  %v2148_v9 = vmax.f32 %v2110_v23, 0.0 }
 0x5e9   : > { %v2151_v3 = vmax.f32 %v2121_v43, 0.0  ;;  %4736 = vmatprep.subr.bf16.mxu1 %v5386_v6 }
 0x5ea   : > { %v2149_v57 = vmax.f32 %v2113_v0, 0.0  ;;  %v5390_v0 = vld [vmem:[#allocation2 + $0xf8] sm:$0xff]  }
 0x5eb   : > { %v2161_v34 = vpack.c.bf16 %v2151_v3, %v2150_v20  ;;  %v6494_v20 = vld [vmem:[%s5613_s18] sm:$0xff]  }
 0x5ec   : > { %v2160_v53 = vpack.c.bf16 %v2149_v57, %v2148_v9  ;;  %v4696_v17 = vpop.f32.mrb[44].mxu1  ;;  %4737 = vmatpush3.bf16.msra.mxu1 %v5386_v6  ;;  %v5389_v6 = vld [vmem:[#allocation2 + $0xf0] sm:$0xff]  }
 0x5ed   : > { %v2134_v14 = vadd.f32 %v4696_v17, %v6475_v52  ;;  %v2125_v30 = vpop.f32.mrb[45].mxu1  ;;  %4738 = vmatprep.subr.bf16.mxu1 %v5387_v40 }
 0x5ee   : > { %v2126_v61 = vadd.f32 %v6475_v52, %v2125_v30  ;;  %v4697_v5 = vpop.f32.mrb[46].mxu1  ;;  %4722 = vmatprep.mubr.bf16.mxu1 %v2160_v53 }
 0x5ef   : > { %v2137_v32 = vadd.f32 %v4697_v5, %v6475_v52  ;;  %v2128_v11 = vpop.f32.mrb[47].mxu1  ;;  %4723 = vmatmul.mubr.bf16.gmra.mrb[56].mxu1 %v2161_v34  ;;  %v2154_v55 = vmax.f32 %v2134_v14, 0.0 }
 0x5f0   : > { %v2129_v22 = vadd.f32 %v6475_v52, %v2128_v11  ;;  %4739 = vmatpush3.bf16.msra.mxu1 %v5387_v40  ;;  %v2152_v23 = vmax.f32 %v2126_v61, 0.0  ;;  %v5397_v52 = vld [vmem:[%s6999_s5 + $0x1b0] sm:$0xff]  }
 0x5f1   : > { %v2155_v2 = vmax.f32 %v2137_v32, 0.0  ;;  %4740 = vmatprep.subr.bf16.mxu1 %v5388_v4  ;;  %4774 = vmatprep.subr.bf16.mxu0 %v5397_v52 }
 0x5f2   : > { %v2153_v48 = vmax.f32 %v2129_v22, 0.0  ;;  %4775 = vmatpush3.bf16.msra.mxu0 %v5397_v52 }
 0x5f3   : > { %v2163_v43 = vpack.c.bf16 %v2155_v2, %v2154_v55 }
 0x5f4   : > { %v2162_v18 = vpack.c.bf16 %v2153_v48, %v2152_v23  ;;  %4741 = vmatpush3.bf16.msra.mxu1 %v5388_v4 }
 0x5f5   : > { %4742 = vmatprep.subr.bf16.mxu1 %v5389_v6 }
 0x5f6   : > { %4726 = vmatprep.mubr.bf16.mxu1 %v2162_v18 }
 0x5f7   : > { %4727 = vmatmul.mubr.bf16.gmra.mrb[60].mxu1 %v2163_v43 }
 0x5f8   : > { %4743 = vmatpush3.bf16.msra.mxu1 %v5389_v6  ;;  %4746 = vmatprep.mubr.bf16.mxu1 %v6494_v20 }
 0x5f9   : > { %4744 = vmatprep.subr.bf16.mxu1 %v5390_v0 }
 0x5fc   : > { %4745 = vmatpush3.bf16.msra.mxu1 %v5390_v0 }
 0x5ff   : > { %4747 = vmatmul.mubr.bf16.vlgmr.msra.gmra.mrb[48].mxu1 %v6204_v50  ;;  %v5398_v50 = vld [vmem:[%s6999_s5 + $0x1b8] sm:$0xff]  }
 0x600   : > { %4750 = vmatprep.mubr.bf16.mxu1 %v6208_v58  ;;  %4776 = vmatprep.subr.bf16.mxu0 %v5398_v50  ;;  %v6513_v58 = vld [vmem:[%s6999_s5 + $0x1c0] sm:$0xff]  }
 0x601   : > { %4777 = vmatpush3.bf16.msra.mxu0 %v5398_v50 }
 0x602   : > { %4794 = vmatprep.subr.bf16.mxu0 %v6513_v58 }
 0x607   : > { %4751 = vmatmul.mubr.bf16.gmra.mrb[52].mxu1 %v6212_v37  ;;  %v6519_v37 = vld [vmem:[%s7000_s6 + $0x5] ss:$0 sm:$0xff] }
 0x608   : > { %4754 = vmatprep.mubr.bf16.mxu1 %v6216_v54  ;;  %v6522_v54 = vadd.f32 nan, %v6519_v37  ;;  %v5098_v40 = vadd.f32 %v6519_v37, %v6280_v26  ;;  %v5101_v34 = vadd.f32 %v6519_v37, %v6288_v42  ;;  %v5119_v52 = vadd.f32 %v6519_v37, %v6355_v33 }
 0x60a   : > { %v2337_v3 = vadd.f32 %v6286_v56, %v6522_v54  ;;  %v2335_v9 = vadd.f32 %v6294_v35, %v6522_v54 }
 0x60f   : > { %4755 = vmatmul.mubr.bf16.gmra.mrb[56].mxu1 %v6220_v44  ;;  %v5104_v44 = vadd.f32 %v6519_v37, %v6297_v29  ;;  %v2336_v29 = vadd.f32 %v6283_v51, %v6522_v54  ;;  %v5110_v51 = vadd.f32 %v6519_v37, %v6328_v36 }
 0x610   : > { %4758 = vmatprep.mubr.bf16.mxu1 %v6224_v8  ;;  %v5107_v8 = vadd.f32 %v6519_v37, %v6301_v39  ;;  %v2334_v39 = vadd.f32 %v6291_v10, %v6522_v54  ;;  %v5113_v10 = vadd.f32 %v6519_v37, %v6332_v25  ;;  %v5116_v25 = vadd.f32 %v6519_v37, %v6341_v59 }
 0x617   : > { %4759 = vmatmul.mubr.bf16.gmra.mrb[60].mxu1 %v6228_v62  ;;  %v6531_v62 = vld [vmem:[%s6998_s4 + $0x3] ss:$0 sm:$0xff] }
 0x618   : > { %v5105_v14 = vadd.f32 %v5104_v44, %v6531_v62  ;;  %v5108_v26 = vadd.f32 %v5107_v8, %v6531_v62  ;;  %v5111_v44 = vadd.f32 %v5110_v51, %v6531_v62  ;;  %v2340_v8 = vadd.f32 %v6315_v28, %v6522_v54  ;;  %v5400_v28 = vld [vmem:[%s6999_s5 + $0x1c8] sm:$0xff]  }
 0x6d2   : > { %v4748_v57 = vpop.f32.mrb[48].mxu1 }
 0x6d3   : > { %v2466_v53 = vadd.f32 %v4748_v57, %v6531_v62  ;;  %v5099_v17 = vadd.f32 %v5098_v40, %v4748_v57  ;;  %v2457_v56 = vpop.f32.mrb[49].mxu1 }
 0x6d4   : > { %v2458_v35 = vadd.f32 %v6531_v62, %v2457_v56  ;;  %v5102_v30 = vadd.f32 %v5101_v34, %v2457_v56  ;;  %v4749_v4 = vpop.f32.mrb[50].mxu1  ;;  %v5117_v34 = vadd.f32 %v5116_v25, %v6531_v62  ;;  %v2344_v25 = vadd.f32 %v6366_v41, %v6522_v54  ;;  %v5402_v41 = vld [vmem:[%s6999_s5 + $0x1d8] sm:$0xff]  }
 0x6d5   : > { %v6553_v61 = vadd.f32 %v2466_v53, %v2336_v29  ;;  %v5100_v42 = vadd.f32 %v5099_v17, %v6531_v62  ;;  %v2469_v5 = vadd.f32 %v4749_v4, %v6531_v62  ;;  %v5106_v32 = vadd.f32 %v5105_v14, %v4749_v4  ;;  %v2460_v11 = vpop.f32.mrb[51].mxu1 }
 0x6d6   : > { %v6557_v22 = vadd.f32 %v2458_v35, %v2334_v39  ;;  %v5103_v55 = vadd.f32 %v5102_v30, %v6531_v62  ;;  %v2461_v2 = vadd.f32 %v6531_v62, %v2460_v11  ;;  %v5109_v6 = vadd.f32 %v5108_v26, %v2460_v11 }
 0x6d7   : > { %v2538_v23 = vmax.f32 %v5100_v42, 0.0  ;;  %v6561_v36 = vadd.f32 %v2469_v5, %v2337_v3  ;;  %v2539_v48 = vmax.f32 %v5106_v32, 0.0  ;;  %v2338_v3 = vadd.f32 %v6321_v31, %v6522_v54 }
 0x6d8   : > { %v2536_v43 = vmax.f32 %v5103_v55, 0.0  ;;  %v6565_v18 = vadd.f32 %v2461_v2, %v2335_v9  ;;  %v2537_v0 = vmax.f32 %v5109_v6, 0.0  ;;  %v5114_v29 = vadd.f32 %v5113_v10, %v6531_v62 }
 0x6d9   : > { %v2553_v50 = vpack.c.bf16 %v2539_v48, %v2538_v23  ;;  %v2341_v9 = vadd.f32 %v6334_v49, %v6522_v54  ;;  %v2339_v31 = vadd.f32 %v6344_v38, %v6522_v54  ;;  %v5120_v49 = vadd.f32 %v5119_v52, %v6531_v62 }
 0x6da   : > { %v4752_v40 = vpop.f32.mrb[52].mxu1  ;;  %v2552_v59 = vpack.c.bf16 %v2537_v0, %v2536_v43  ;;  %v5122_v4 = vadd.f32 %v6519_v37, %v6379_v13  ;;  %v5125_v42 = vadd.f32 %v6519_v37, %v6383_v47  ;;  %v5128_v55 = vadd.f32 %v6519_v37, %v6391_v19  ;;  %v5401_v13 = vld [vmem:[%s6999_s5 + $0x1d0] sm:$0xff]  }
 0x6db   : > { %v2482_v57 = vadd.f32 %v4752_v40, %v6531_v62  ;;  %v5112_v39 = vadd.f32 %v5111_v44, %v4752_v40  ;;  %v2473_v33 = vpop.f32.mrb[53].mxu1  ;;  %v5131_v47 = vadd.f32 %v6519_v37, %v6405_v12  ;;  %v2342_v19 = vadd.f32 %v6369_v63, %v6522_v54 }
 0x6dc   : > { %v2474_v53 = vadd.f32 %v6531_v62, %v2473_v33  ;;  %v5115_v17 = vadd.f32 %v5114_v29, %v2473_v33  ;;  %v4753_v56 = vpop.f32.mrb[54].mxu1  ;;  %4778 = vmatprep.mubr.bf16.mxu0 %v2552_v59  ;;  %v5126_v0 = vadd.f32 %v5125_v42, %v6531_v62  ;;  %v2343_v63 = vadd.f32 %v6394_v46, %v6522_v54 }
 0x6dd   : > { %v6586_v14 = vadd.f32 %v2482_v57, %v2340_v8  ;;  %v2485_v26 = vadd.f32 %v4753_v56, %v6531_v62  ;;  %v5118_v35 = vadd.f32 %v5117_v34, %v4753_v56  ;;  %v2476_v30 = vpop.f32.mrb[55].mxu1  ;;  %4779 = vmatmul.mubr.bf16.vlgmr.msra.gmra.mrb[48].mxu0 %v2553_v50  ;;  %v2542_v5 = vmax.f32 %v5112_v39, 0.0 }
 0x6de   : > { %v6591_v51 = vadd.f32 %v2474_v53, %v2338_v3  ;;  %v2477_v38 = vadd.f32 %v6531_v62, %v2476_v30  ;;  %v5121_v10 = vadd.f32 %v5120_v49, %v2476_v30  ;;  %4795 = vmatpush3.bf16.msra.mxu0 %v6513_v58  ;;  %v2540_v2 = vmax.f32 %v5115_v17, 0.0 }
 0x6df   : > { %v6597_v32 = vadd.f32 %v2485_v26, %v2341_v9  ;;  %v2543_v11 = vmax.f32 %v5118_v35, 0.0  ;;  %4796 = vmatprep.subr.bf16.mxu0 %v5400_v28  ;;  %v5123_v58 = vadd.f32 %v5122_v4, %v6531_v62  ;;  %v2345_v50 = vadd.f32 %v6385_v60, %v6522_v54 }
 0x6e0   : > { %v6604_v6 = vadd.f32 %v2477_v38, %v2339_v31  ;;  %v2541_v23 = vmax.f32 %v5121_v10, 0.0  ;;  %v5129_v3 = vadd.f32 %v5128_v55, %v6531_v62  ;;  %v5132_v60 = vadd.f32 %v5131_v47, %v6531_v62 }
 0x6e1   : > { %v2555_v48 = vpack.c.bf16 %v2543_v11, %v2542_v5  ;;  %v5134_v34 = vadd.f32 %v6519_v37, %v6427_v24  ;;  %v5137_v53 = vadd.f32 %v6519_v37, %v6431_v1  ;;  %v5140_v26 = vadd.f32 %v6519_v37, %v6437_v27  ;;  %v5403_v24 = vld [vmem:[%s6999_s5 + $0x1e0] sm:$0xff]  }
 0x6e2   : > { %v4756_v43 = vpop.f32.mrb[56].mxu1  ;;  %v2554_v52 = vpack.c.bf16 %v2541_v23, %v2540_v2  ;;  %4797 = vmatpush3.bf16.msra.mxu0 %v5400_v28  ;;  %v5143_v1 = vadd.f32 %v6519_v37, %v6445_v45  ;;  %v2348_v27 = vadd.f32 %v6414_v15, %v6522_v54  ;;  %v5404_v45 = vld [vmem:[%s6999_s5 + $0x1e8] sm:$0xff]   ;;  %v2346_v37 = vadd.f32 %v6419_v7, %v6522_v54 }
 0x6e3   : > { %v2498_v44 = vadd.f32 %v4756_v43, %v6531_v62  ;;  %v5124_v12 = vadd.f32 %v5123_v58, %v4756_v43  ;;  %v2489_v8 = vpop.f32.mrb[57].mxu1  ;;  %4798 = vmatprep.subr.bf16.mxu0 %v5401_v13  ;;  %v5135_v38 = vadd.f32 %v5134_v34, %v6531_v62  ;;  %v5138_v5 = vadd.f32 %v5137_v53, %v6531_v62  ;;  %v5419_v34 = vld [vmem:[%s6999_s5 + $0x220] sm:$0xff]  }
 0x6e4   : > { %v2490_v40 = vadd.f32 %v6531_v62, %v2489_v8  ;;  %v5127_v29 = vadd.f32 %v5126_v0, %v2489_v8  ;;  %v4757_v59 = vpop.f32.mrb[58].mxu1  ;;  %4782 = vmatprep.mubr.bf16.mxu0 %v2554_v52  ;;  %v5141_v23 = vadd.f32 %v5140_v26, %v6531_v62  ;;  %v5144_v15 = vadd.f32 %v5143_v1, %v6531_v62 }
 0x6e5   : > { %v6625_v9 = vadd.f32 %v2498_v44, %v2344_v25  ;;  %v2501_v57 = vadd.f32 %v4757_v59, %v6531_v62  ;;  %v5130_v39 = vadd.f32 %v5129_v3, %v4757_v59  ;;  %v2492_v33 = vpop.f32.mrb[59].mxu1  ;;  %4783 = vmatmul.mubr.bf16.gmra.mrb[52].mxu0 %v2555_v48  ;;  %v2546_v17 = vmax.f32 %v5124_v12, 0.0 }
 0x6e6   : > { %v6630_v28 = vadd.f32 %v2490_v40, %v2342_v19  ;;  %v2493_v46 = vadd.f32 %v6531_v62, %v2492_v33  ;;  %v5133_v31 = vadd.f32 %v5132_v60, %v2492_v33  ;;  %4799 = vmatpush3.bf16.msra.mxu0 %v5401_v13  ;;  %v2544_v35 = vmax.f32 %v5127_v29, 0.0  ;;  %v5415_v60 = vld [vmem:[%s6999_s5 + $0x200] sm:$0xff]   ;;  %v5418_v33 = vld [vmem:[%s6999_s5 + $0x218] sm:$0xff]  }
 0x6e7   : > { %v6635_v56 = vadd.f32 %v2501_v57, %v2345_v50  ;;  %v2547_v49 = vmax.f32 %v5130_v39, 0.0  ;;  %4800 = vmatprep.subr.bf16.mxu0 %v5402_v41  ;;  %v2349_v25 = vadd.f32 %v6433_v21, %v6522_v54  ;;  %v2347_v7 = vadd.f32 %v6440_v16, %v6522_v54  ;;  %v5405_v16 = vld [vmem:[%s6999_s5 + $0x1f0] sm:$0xff]   ;;  %v5406_v54 = vld [vmem:[%s6999_s5 + $0x1f8] sm:$0xff]   ;;  %v5416_v57 = vld [vmem:[%s6999_s5 + $0x208] sm:$0xff]   ;;  %4858 = vmatprep.subr.bf16.mxu1 %v5415_v60 }
 0x6e8   : > { %v6642_v30 = vadd.f32 %v2493_v46, %v2343_v63  ;;  %v2545_v4 = vmax.f32 %v5133_v31, 0.0  ;;  %4859 = vmatpush3.bf16.msra.mxu1 %v5415_v60  ;;  %v5417_v39 = vld [vmem:[%s6999_s5 + $0x210] sm:$0xff]   ;;  %v5420_v46 = vld [vmem:[%s6999_s5 + $0x228] sm:$0xff]   ;;  %v6700_v31 = vld [vmem:[%s7000_s6 + $0x6] ss:$0 sm:$0xff] }
 0x6e9   : > { %v2557_v10 = vpack.c.bf16 %v2547_v49, %v2546_v17  ;;  %4860 = vmatprep.subr.bf16.mxu1 %v5416_v57 }
 0x6ea   : > { %v4760_v42 = vpop.f32.mrb[60].mxu1  ;;  %v2556_v11 = vpack.c.bf16 %v2545_v4, %v2544_v35  ;;  %4801 = vmatpush3.bf16.msra.mxu0 %v5402_v41 }
 0x6eb   : > { %v2514_v55 = vadd.f32 %v4760_v42, %v6531_v62  ;;  %v5136_v13 = vadd.f32 %v5135_v38, %v4760_v42  ;;  %v2505_v2 = vpop.f32.mrb[61].mxu1  ;;  %4802 = vmatprep.subr.bf16.mxu0 %v5403_v24 }
 0x6ec   : > { %v2506_v47 = vadd.f32 %v6531_v62, %v2505_v2  ;;  %v5139_v58 = vadd.f32 %v5138_v5, %v2505_v2  ;;  %v4761_v48 = vpop.f32.mrb[62].mxu1  ;;  %4786 = vmatprep.mubr.bf16.mxu0 %v2556_v11  ;;  %4861 = vmatpush3.bf16.msra.mxu1 %v5416_v57  ;;  %v5411_v57 = vld [vmem:[#allocation2 + $0x120] sm:$0xff]  }
 0x6ed   : > { %v6661_v19 = vadd.f32 %v2514_v55, %v2348_v27  ;;  %v2517_v43 = vadd.f32 %v4761_v48, %v6531_v62  ;;  %v5142_v0 = vadd.f32 %v5141_v23, %v4761_v48  ;;  %v2508_v52 = vpop.f32.mrb[63].mxu1  ;;  %4787 = vmatmul.mubr.bf16.gmra.mrb[56].mxu0 %v2557_v10  ;;  %v2550_v8 = vmax.f32 %v5136_v13, 0.0  ;;  %4862 = vmatprep.subr.bf16.mxu1 %v5417_v39  ;;  %v5408_v23 = vld [vmem:[#allocation2 + $0x108] sm:$0xff]  }
 0x6ee   : > { %v6666_v50 = vadd.f32 %v2506_v47, %v2346_v37  ;;  %v2509_v44 = vadd.f32 %v6531_v62, %v2508_v52  ;;  %v5145_v12 = vadd.f32 %v5144_v15, %v2508_v52  ;;  %4803 = vmatpush3.bf16.msra.mxu0 %v5403_v24  ;;  %v2548_v41 = vmax.f32 %v5139_v58, 0.0  ;;  %v5407_v62 = vld [vmem:[#allocation2 + $0x100] sm:$0xff]  }
 0x6ef   : > { %v6669_v3 = vadd.f32 %v2517_v43, %v2349_v25  ;;  %v2551_v21 = vmax.f32 %v5142_v0, 0.0  ;;  %4804 = vmatprep.subr.bf16.mxu0 %v5404_v45  ;;  %v5409_v43 = vld [vmem:[#allocation2 + $0x110] sm:$0xff]  }
 0x6f0   : > { %v6671_v63 = vadd.f32 %v2509_v44, %v2347_v7  ;;  %v2549_v40 = vmax.f32 %v5145_v12, 0.0  ;;  %4863 = vmatpush3.bf16.msra.mxu1 %v5417_v39 }
 0x6f1   : > { %v2559_v29 = vpack.c.bf16 %v2551_v21, %v2550_v8  ;;  %4864 = vmatprep.subr.bf16.mxu1 %v5418_v33 }
 0x6f2   : > { %v2558_v59 = vpack.c.bf16 %v2549_v40, %v2548_v41  ;;  %4805 = vmatpush3.bf16.msra.mxu0 %v5404_v45  ;;  %v5410_v41 = vld [vmem:[#allocation2 + $0x118] sm:$0xff]  }
 0x6f3   : > { %4806 = vmatprep.subr.bf16.mxu0 %v5405_v16 }
 0x6f4   : > { %4790 = vmatprep.mubr.bf16.mxu0 %v2558_v59  ;;  %4865 = vmatpush3.bf16.msra.mxu1 %v5418_v33 }
 0x6f5   : > { %4791 = vmatmul.mubr.bf16.gmra.mrb[60].mxu0 %v2559_v29  ;;  %4866 = vmatprep.subr.bf16.mxu1 %v5419_v34 }
 0x6f6   : > { %4807 = vmatpush3.bf16.msra.mxu0 %v5405_v16 }
 0x6f7   : > { %4808 = vmatprep.subr.bf16.mxu0 %v5406_v54 }
 0x6f8   : > { %4867 = vmatpush3.bf16.msra.mxu1 %v5419_v34 }
 0x6f9   : > { %4868 = vmatprep.subr.bf16.mxu1 %v5420_v46 }
 0x6fa   : > { %4809 = vmatpush3.bf16.msra.mxu0 %v5406_v54 }
 0x6fb   : > { %4826 = vmatprep.subr.bf16.mxu0 %v5407_v62 }
 0x6fc   : > { %4869 = vmatpush3.bf16.msra.mxu1 %v5420_v46 }
 0x7b0   : > { %v4780_v53 = vpop.f32.mrb[48].mxu0 }
 0x7b1   : > { %v2676_v17 = vadd.f32 %v4780_v53, %v6700_v31  ;;  %v2667_v49 = vpop.f32.mrb[49].mxu0 }
 0x7b2   : > { %v2668_v26 = vadd.f32 %v6700_v31, %v2667_v49  ;;  %v4781_v24 = vpop.f32.mrb[50].mxu0 }
 0x7b3   : > { %v2679_v35 = vadd.f32 %v4781_v24, %v6700_v31  ;;  %v2670_v4 = vpop.f32.mrb[51].mxu0  ;;  %v2732_v38 = vmax.f32 %v2676_v17, 0.0 }
 0x7b4   : > { %v2671_v1 = vadd.f32 %v6700_v31, %v2670_v4  ;;  %v2730_v42 = vmax.f32 %v2668_v26, 0.0  ;;  %v5412_v26 = vld [vmem:[#allocation2 + $0x128] sm:$0xff]  }
 0x7b5   : > { %v2733_v10 = vmax.f32 %v2679_v35, 0.0 }
 0x7b6   : > { %v2731_v5 = vmax.f32 %v2671_v1, 0.0 }
 0x7b7   : > { %v2747_v11 = vpack.c.bf16 %v2733_v10, %v2732_v38 }
 0x7b8   : > { %v2746_v27 = vpack.c.bf16 %v2731_v5, %v2730_v42  ;;  %v4784_v55 = vpop.f32.mrb[52].mxu0  ;;  %v5413_v5 = vld [vmem:[#allocation2 + $0x130] sm:$0xff]  }
 0x7b9   : > { %v2692_v13 = vadd.f32 %v4784_v55, %v6700_v31  ;;  %v2683_v2 = vpop.f32.mrb[53].mxu0 }
 0x7ba   : > { %v2684_v45 = vadd.f32 %v6700_v31, %v2683_v2  ;;  %v4785_v37 = vpop.f32.mrb[54].mxu0  ;;  %4810 = vmatprep.mubr.bf16.mxu0 %v2746_v27  ;;  %v5414_v2 = vld [vmem:[#allocation2 + $0x138] sm:$0xff]  }
 0x7bb   : > { %v2695_v47 = vadd.f32 %v4785_v37, %v6700_v31  ;;  %v2686_v58 = vpop.f32.mrb[55].mxu0  ;;  %4811 = vmatmul.mubr.bf16.vlgmr.msra.gmra.mrb[64].mxu0 %v2747_v11  ;;  %v2736_v15 = vmax.f32 %v2692_v13, 0.0  ;;  %v5451_v37 = vld [vmem:[%s5613_s18 + $0x20] sm:$0xff]  }
 0x7bc   : > { %v2687_v48 = vadd.f32 %v6700_v31, %v2686_v58  ;;  %4827 = vmatpush3.bf16.msra.mxu0 %v5407_v62  ;;  %v2734_v0 = vmax.f32 %v2684_v45, 0.0  ;;  %v5450_v45 = vld [vmem:[%s5613_s18 + $0x18] sm:$0xff]   ;;  %v5453_v58 = vld [vmem:[%s5613_s18 + $0x30] sm:$0xff]  }
 0x7bd   : > { %v2737_v25 = vmax.f32 %v2695_v47, 0.0  ;;  %4828 = vmatprep.subr.bf16.mxu0 %v5408_v23  ;;  %v5452_v47 = vld [vmem:[%s5613_s18 + $0x28] sm:$0xff]  }
 0x7be   : > { %v2735_v52 = vmax.f32 %v2687_v48, 0.0  ;;  %v5454_v48 = vld [vmem:[%s5613_s18 + $0x38] sm:$0xff]  }
 0x7bf   : > { %v2749_v7 = vpack.c.bf16 %v2737_v25, %v2736_v15  ;;  %v5422_v15 = vld [vmem:[%s6999_s5 + $0x238] sm:$0xff]   ;;  %v5423_v25 = vld [vmem:[%s6999_s5 + $0x240] sm:$0xff]  }
 0x7c0   : > { %v2748_v44 = vpack.c.bf16 %v2735_v52, %v2734_v0  ;;  %v4788_v12 = vpop.f32.mrb[56].mxu0  ;;  %4829 = vmatpush3.bf16.msra.mxu0 %v5408_v23  ;;  %v5449_v23 = vld [vmem:[%s5613_s18 + $0x10] sm:$0xff]   ;;  %v6745_v52 = vld [vmem:[%s6998_s4 + $0x4] ss:$0 sm:$0xff] }
 0x7c1   : > { %v2708_v8 = vadd.f32 %v4788_v12, %v6700_v31  ;;  %v2699_v21 = vpop.f32.mrb[57].mxu0  ;;  %4830 = vmatprep.subr.bf16.mxu0 %v5409_v43 }
 0x7c2   : > { %v2700_v40 = vadd.f32 %v6700_v31, %v2699_v21  ;;  %v4789_v29 = vpop.f32.mrb[58].mxu0  ;;  %4814 = vmatprep.mubr.bf16.mxu0 %v2748_v44 }
 0x7c3   : > { %v2711_v59 = vadd.f32 %v4789_v29, %v6700_v31  ;;  %v2702_v16 = vpop.f32.mrb[59].mxu0  ;;  %4815 = vmatmul.mubr.bf16.gmra.mrb[68].mxu0 %v2749_v7  ;;  %v2740_v62 = vmax.f32 %v2708_v8, 0.0 }
 0x7c4   : > { %v2703_v54 = vadd.f32 %v6700_v31, %v2702_v16  ;;  %4831 = vmatpush3.bf16.msra.mxu0 %v5409_v43  ;;  %v2738_v39 = vmax.f32 %v2700_v40, 0.0  ;;  %v6738_v43 = vld [vmem:[%s7000_s6 + $0x7] ss:$0 sm:$0xff] }
 0x7c5   : > { %v2741_v60 = vmax.f32 %v2711_v59, 0.0  ;;  %4832 = vmatprep.subr.bf16.mxu0 %v5410_v41  ;;  %v5152_v0 = vadd.f32 %v6738_v43, %v6561_v36  ;;  %v5155_v7 = vadd.f32 %v6738_v43, %v6565_v18  ;;  %v5146_v44 = vadd.f32 %v6738_v43, %v6553_v61 }
 0x7c6   : > { %v2739_v33 = vmax.f32 %v2703_v54, 0.0  ;;  %v5149_v8 = vadd.f32 %v6738_v43, %v6557_v22  ;;  %v5158_v61 = vadd.f32 %v6738_v43, %v6586_v14  ;;  %v5167_v14 = vadd.f32 %v6738_v43, %v6604_v6 }
 0x7c7   : > { %v2751_v34 = vpack.c.bf16 %v2741_v60, %v2740_v62  ;;  %v5153_v40 = vadd.f32 %v5152_v0, %v6745_v52  ;;  %v5156_v59 = vadd.f32 %v5155_v7, %v6745_v52  ;;  %v5161_v60 = vadd.f32 %v6738_v43, %v6591_v51 }
 0x7c8   : > { %v2750_v46 = vpack.c.bf16 %v2739_v33, %v2738_v39  ;;  %v4792_v53 = vpop.f32.mrb[60].mxu0  ;;  %4833 = vmatpush3.bf16.msra.mxu0 %v5410_v41  ;;  %v5164_v33 = vadd.f32 %v6738_v43, %v6597_v32  ;;  %v5424_v32 = vld [vmem:[%s6999_s5 + $0x248] sm:$0xff]   ;;  %v5168_v6 = vadd.f32 %v5167_v14, %v6745_v52 }
 0x7c9   : > { %v2724_v17 = vadd.f32 %v4792_v53, %v6700_v31  ;;  %v2715_v49 = vpop.f32.mrb[61].mxu0  ;;  %4834 = vmatprep.subr.bf16.mxu0 %v5411_v57  ;;  %v5159_v53 = vadd.f32 %v5158_v61, %v6745_v52 }
 0x7ca   : > { %v2716_v24 = vadd.f32 %v6700_v31, %v2715_v49  ;;  %v4793_v35 = vpop.f32.mrb[62].mxu0  ;;  %4818 = vmatprep.mubr.bf16.mxu0 %v2750_v46  ;;  %v5162_v49 = vadd.f32 %v5161_v60, %v6745_v52 }
 0x7cb   : > { %v2727_v4 = vadd.f32 %v4793_v35, %v6700_v31  ;;  %v2718_v1 = vpop.f32.mrb[63].mxu0  ;;  %4819 = vmatmul.mubr.bf16.gmra.mrb[72].mxu0 %v2751_v34  ;;  %v2744_v10 = vmax.f32 %v2724_v17, 0.0 }
 0x7cc   : > { %v2719_v38 = vadd.f32 %v6700_v31, %v2718_v1  ;;  %4835 = vmatpush3.bf16.msra.mxu0 %v5411_v57  ;;  %v2742_v11 = vmax.f32 %v2716_v24, 0.0  ;;  %v5448_v31 = vld [vmem:[%s5613_s18 + $0x8] sm:$0xff]  }
 0x7cd   : > { %v2745_v42 = vmax.f32 %v2727_v4, 0.0  ;;  %4836 = vmatprep.subr.bf16.mxu0 %v5412_v26  ;;  %v5165_v4 = vadd.f32 %v5164_v33, %v6745_v52 }
 0x7ce   : > { %v2743_v27 = vmax.f32 %v2719_v38, 0.0 }
 0x7cf   : > { %v2753_v55 = vpack.c.bf16 %v2745_v42, %v2744_v10 }
 0x7d0   : > { %v2752_v13 = vpack.c.bf16 %v2743_v27, %v2742_v11  ;;  %4837 = vmatpush3.bf16.msra.mxu0 %v5412_v26  ;;  %v5173_v27 = vadd.f32 %v6738_v43, %v6630_v28 }
 0x7d1   : > { %4838 = vmatprep.subr.bf16.mxu0 %v5413_v5 }
 0x7d2   : > { %4822 = vmatprep.mubr.bf16.mxu0 %v2752_v13  ;;  %v5176_v13 = vadd.f32 %v6738_v43, %v6635_v56 }
 0x7d3   : > { %4823 = vmatmul.mubr.bf16.gmra.mrb[76].mxu0 %v2753_v55 }
 0x7d4   : > { %4839 = vmatpush3.bf16.msra.mxu0 %v5413_v5  ;;  %4842 = vmatprep.mubr.bf16.mxu0 %v6494_v20  ;;  %v5421_v20 = vld [vmem:[%s6999_s5 + $0x230] sm:$0xff]   ;;  %v5170_v5 = vadd.f32 %v6738_v43, %v6625_v9 }
 0x7d5   : > { %4840 = vmatprep.subr.bf16.mxu0 %v5414_v2  ;;  %4870 = vmatprep.subr.bf16.mxu1 %v5421_v20 }
 0x7d6   : > { %4871 = vmatpush3.bf16.msra.mxu1 %v5421_v20  ;;  %v5177_v20 = vadd.f32 %v5176_v13, %v6745_v52  ;;  %v5434_v13 = vld [vmem:[%s7001_s7 + $0x18] sm:$0xff]  }
 0x7d7   : > { %4872 = vmatprep.subr.bf16.mxu1 %v5422_v15 }
 0x7d8   : > { %4841 = vmatpush3.bf16.msra.mxu0 %v5414_v2  ;;  %v5425_v2 = vld [vmem:[%s6999_s5 + $0x250] sm:$0xff]  }
 0x7da   : > { %4873 = vmatpush3.bf16.msra.mxu1 %v5422_v15 }
 0x7db   : > { %4843 = vmatmul.mubr.bf16.vlgmr.msra.gmra.mrb[64].mxu0 %v5448_v31  ;;  %4890 = vmatprep.subr.bf16.mxu1 %v5423_v25 }
 0x7dc   : > { %4846 = vmatprep.mubr.bf16.mxu0 %v5449_v23  ;;  %v5179_v23 = vadd.f32 %v6738_v43, %v6642_v30  ;;  %v5426_v30 = vld [vmem:[%s6999_s5 + $0x258] sm:$0xff]  }
 0x7de   : > { %v5180_v7 = vadd.f32 %v5179_v23, %v6745_v52 }
 0x7e3   : > { %4847 = vmatmul.mubr.bf16.gmra.mrb[68].mxu0 %v5450_v45  ;;  %v5171_v45 = vadd.f32 %v5170_v5, %v6745_v52  ;;  %v5431_v5 = vld [vmem:[%s7001_s7] sm:$0xff]  }
 0x7e4   : > { %4850 = vmatprep.mubr.bf16.mxu0 %v5451_v37  ;;  %4922 = vmatprep.subr.bf16.mxu0 %v5431_v5 }
 0x7e5   : > { %4923 = vmatpush3.bf16.msra.mxu0 %v5431_v5 }
 0x7eb   : > { %4851 = vmatmul.mubr.bf16.gmra.mrb[72].mxu0 %v5452_v47  ;;  %v5174_v47 = vadd.f32 %v5173_v27, %v6745_v52  ;;  %v5432_v27 = vld [vmem:[%s7001_s7 + $0x8] sm:$0xff]  }
 0x7ec   : > { %4854 = vmatprep.mubr.bf16.mxu0 %v5453_v58  ;;  %4924 = vmatprep.subr.bf16.mxu0 %v5432_v27 }
 0x7ed   : > { %4925 = vmatpush3.bf16.msra.mxu0 %v5432_v27 }
 0x7f3   : > { %4855 = vmatmul.mubr.bf16.gmra.mrb[76].mxu0 %v5454_v48 }
 0x8ae   : > { %v4844_v12 = vpop.f32.mrb[64].mxu0 }
 0x8af   : > { %v5147_v21 = vadd.f32 %v5146_v44, %v4844_v12  ;;  %v3047_v41 = vpop.f32.mrb[65].mxu0 }
 0x8b0   : > { %v5150_v36 = vadd.f32 %v5149_v8, %v3047_v41  ;;  %v4845_v29 = vpop.f32.mrb[66].mxu0  ;;  %v5182_v8 = vadd.f32 %v6738_v43, %v6661_v19  ;;  %v5185_v41 = vadd.f32 %v6738_v43, %v6666_v50 }
 0x8b1   : > { %v6756_v16 = vadd.f32 %v5147_v21, %v6745_v52  ;;  %v6758_v54 = vadd.f32 %v5153_v40, %v4845_v29  ;;  %v3050_v18 = vpop.f32.mrb[67].mxu0  ;;  %v5427_v29 = vld [vmem:[%s6999_s5 + $0x260] sm:$0xff]  }
 0x8b2   : > { %v6763_v62 = vadd.f32 %v5150_v36, %v6745_v52  ;;  %v6765_v22 = vadd.f32 %v5156_v59, %v3050_v18  ;;  %v5188_v36 = vadd.f32 %v6738_v43, %v6669_v3  ;;  %v5191_v18 = vadd.f32 %v6738_v43, %v6671_v63  ;;  %v5428_v63 = vld [vmem:[%s6999_s5 + $0x268] sm:$0xff]  }
 0x8b3   : > { %v3128_v57 = vmax.f32 %v6756_v16, 0.0  ;;  %v3129_v39 = vmax.f32 %v6758_v54, 0.0  ;;  %v5183_v61 = vadd.f32 %v5182_v8, %v6745_v52 }
 0x8b4   : > { %v3126_v34 = vmax.f32 %v6763_v62, 0.0  ;;  %v3127_v46 = vmax.f32 %v6765_v22, 0.0 }
 0x8b5   : > { %v3143_v26 = vpack.c.bf16 %v3129_v39, %v3128_v57  ;;  %v5186_v57 = vadd.f32 %v5185_v41, %v6745_v52 }
 0x8b6   : > { %v4848_v17 = vpop.f32.mrb[68].mxu0  ;;  %v3142_v51 = vpack.c.bf16 %v3127_v46, %v3126_v34  ;;  %v5189_v34 = vadd.f32 %v5188_v36, %v6745_v52 }
 0x8b7   : > { %v6779_v24 = vadd.f32 %v5159_v53, %v4848_v17  ;;  %v3063_v35 = vpop.f32.mrb[69].mxu0  ;;  %v5192_v53 = vadd.f32 %v5191_v18, %v6745_v52  ;;  %v5429_v52 = vld [vmem:[%s6999_s5 + $0x270] sm:$0xff]  }
 0x8b8   : > { %v6785_v1 = vadd.f32 %v5162_v49, %v3063_v35  ;;  %v4849_v38 = vpop.f32.mrb[70].mxu0  ;;  %4874 = vmatprep.mubr.bf16.mxu1 %v3142_v51 }
 0x8b9   : > { %v6788_v10 = vadd.f32 %v5165_v4, %v4849_v38  ;;  %v3066_v42 = vpop.f32.mrb[71].mxu0  ;;  %4875 = vmatmul.mubr.bf16.vlgmr.msra.gmra.mrb[64].mxu1 %v3143_v26  ;;  %v3132_v28 = vmax.f32 %v6779_v24, 0.0 }
 0x8ba   : > { %v6792_v11 = vadd.f32 %v5168_v6, %v3066_v42  ;;  %4891 = vmatpush3.bf16.msra.mxu1 %v5423_v25  ;;  %v3130_v31 = vmax.f32 %v6785_v1, 0.0  ;;  %v5430_v42 = vld [vmem:[%s6999_s5 + $0x278] sm:$0xff]  }
 0x8bb   : > { %v3133_v55 = vmax.f32 %v6788_v10, 0.0  ;;  %4892 = vmatprep.subr.bf16.mxu1 %v5424_v32 }
 0x8bc   : > { %v3131_v9 = vmax.f32 %v6792_v11, 0.0 }
 0x8bd   : > { %v3145_v15 = vpack.c.bf16 %v3133_v55, %v3132_v28  ;;  %v5433_v55 = vld [vmem:[%s7001_s7 + $0x10] sm:$0xff]  }
 0x8be   : > { %v4852_v37 = vpop.f32.mrb[72].mxu0  ;;  %v3144_v56 = vpack.c.bf16 %v3131_v9, %v3130_v31  ;;  %4893 = vmatpush3.bf16.msra.mxu1 %v5424_v32  ;;  %4926 = vmatprep.subr.bf16.mxu0 %v5433_v55  ;;  %v6884_v31 = vld [vmem:[%s7000_s6 + $0x8] ss:$0 sm:$0xff] }
 0x8bf   : > { %v6809_v58 = vadd.f32 %v5171_v45, %v4852_v37  ;;  %v3079_v48 = vpop.f32.mrb[73].mxu0  ;;  %4894 = vmatprep.subr.bf16.mxu1 %v5425_v2  ;;  %4927 = vmatpush3.bf16.msra.mxu0 %v5433_v55 }
 0x8c0   : > { %v6815_v25 = vadd.f32 %v5174_v47, %v3079_v48  ;;  %v4853_v0 = vpop.f32.mrb[74].mxu0  ;;  %4878 = vmatprep.mubr.bf16.mxu1 %v3144_v56  ;;  %4928 = vmatprep.subr.bf16.mxu0 %v5434_v13 }
 0x8c1   : > { %v6818_v44 = vadd.f32 %v5177_v20, %v4853_v0  ;;  %v3082_v12 = vpop.f32.mrb[75].mxu0  ;;  %4879 = vmatmul.mubr.bf16.gmra.mrb[68].mxu1 %v3145_v15  ;;  %v3136_v50 = vmax.f32 %v6809_v58, 0.0 }
 0x8c2   : > { %v6822_v21 = vadd.f32 %v5180_v7, %v3082_v12  ;;  %4895 = vmatpush3.bf16.msra.mxu1 %v5425_v2  ;;  %v3134_v59 = vmax.f32 %v6815_v25, 0.0  ;;  %v6877_v2 = vld [vmem:[%s7001_s7 + $0x20] sm:$0xff]  }
 0x8c3   : > { %v3137_v40 = vmax.f32 %v6818_v44, 0.0  ;;  %4896 = vmatprep.subr.bf16.mxu1 %v5426_v30  ;;  %4929 = vmatpush3.bf16.msra.mxu0 %v5434_v13 }
 0x8c4   : > { %v3135_v19 = vmax.f32 %v6822_v21, 0.0  ;;  %4930 = vmatprep.subr.bf16.mxu0 %v6877_v2 }
 0x8c5   : > { %v3147_v46 = vpack.c.bf16 %v3137_v40, %v3136_v50 }
 0x8c6   : > { %v4856_v60 = vpop.f32.mrb[76].mxu0  ;;  %v3146_v3 = vpack.c.bf16 %v3135_v19, %v3134_v59  ;;  %4897 = vmatpush3.bf16.msra.mxu1 %v5426_v30 }
 0x8c7   : > { %v6839_v39 = vadd.f32 %v5183_v61, %v4856_v60  ;;  %v3095_v33 = vpop.f32.mrb[77].mxu0  ;;  %4898 = vmatprep.subr.bf16.mxu1 %v5427_v29  ;;  %4931 = vmatpush3.bf16.msra.mxu0 %v6877_v2 }
 0x8c8   : > { %v6845_v43 = vadd.f32 %v5186_v57, %v3095_v33  ;;  %v4857_v14 = vpop.f32.mrb[78].mxu0  ;;  %4882 = vmatprep.mubr.bf16.mxu1 %v3146_v3 }
 0x8c9   : > { %v6848_v17 = vadd.f32 %v5189_v34, %v4857_v14  ;;  %v3098_v49 = vpop.f32.mrb[79].mxu0  ;;  %4883 = vmatmul.mubr.bf16.gmra.mrb[72].mxu1 %v3147_v46  ;;  %v3140_v32 = vmax.f32 %v6839_v39, 0.0 }
 0x8ca   : > { %v6850_v51 = vadd.f32 %v5192_v53, %v3098_v49  ;;  %4899 = vmatpush3.bf16.msra.mxu1 %v5427_v29  ;;  %v3138_v35 = vmax.f32 %v6845_v43, 0.0 }
 0x8cb   : > { %v3141_v26 = vmax.f32 %v6848_v17, 0.0  ;;  %4900 = vmatprep.subr.bf16.mxu1 %v5428_v63 }
 0x8cc   : > { %v3139_v4 = vmax.f32 %v6850_v51, 0.0 }
 0x8cd   : > { %v3149_v6 = vpack.c.bf16 %v3141_v26, %v3140_v32 }
 0x8ce   : > { %v3148_v38 = vpack.c.bf16 %v3139_v4, %v3138_v35  ;;  %4901 = vmatpush3.bf16.msra.mxu1 %v5428_v63 }
 0x8cf   : > { %4902 = vmatprep.subr.bf16.mxu1 %v5429_v52 }
 0x8d0   : > { %4886 = vmatprep.mubr.bf16.mxu1 %v3148_v38 }
 0x8d1   : > { %4887 = vmatmul.mubr.bf16.gmra.mrb[76].mxu1 %v3149_v6 }
 0x8d2   : > { %4903 = vmatpush3.bf16.msra.mxu1 %v5429_v52 }
 0x8d3   : > { %4904 = vmatprep.subr.bf16.mxu1 %v5430_v42 }
 0x8d6   : > { %4905 = vmatpush3.bf16.msra.mxu1 %v5430_v42 }
 0x8d7   : > { %4954 = vmatprep.subr.bf16.mxu1 %v5431_v5 }
 0x98c   : > { %v4876_v9 = vpop.f32.mrb[64].mxu1 }
 0x98d   : > { %v3266_v23 = vadd.f32 %v4876_v9, %v6884_v31  ;;  %v3257_v28 = vpop.f32.mrb[65].mxu1 }
 0x98e   : > { %v3258_v45 = vadd.f32 %v6884_v31, %v3257_v28  ;;  %v4877_v37 = vpop.f32.mrb[66].mxu1 }
 0x98f   : > { %v3269_v47 = vadd.f32 %v4877_v37, %v6884_v31  ;;  %v3260_v56 = vpop.f32.mrb[67].mxu1  ;;  %v3322_v20 = vmax.f32 %v3266_v23, 0.0 }
 0x990   : > { %v3261_v48 = vadd.f32 %v6884_v31, %v3260_v56  ;;  %v3320_v30 = vmax.f32 %v3258_v45, 0.0 }
 0x991   : > { %v3323_v15 = vmax.f32 %v3269_v47, 0.0 }
 0x992   : > { %v3321_v0 = vmax.f32 %v3261_v48, 0.0 }
 0x993   : > { %v3337_v7 = vpack.c.bf16 %v3323_v15, %v3322_v20 }
 0x994   : > { %v3336_v12 = vpack.c.bf16 %v3321_v0, %v3320_v30  ;;  %v4880_v8 = vpop.f32.mrb[68].mxu1  ;;  %v5436_v30 = vld [vmem:[%s7001_s7 + $0x28] sm:$0xff]  }
 0x995   : > { %v3282_v41 = vadd.f32 %v4880_v8, %v6884_v31  ;;  %v3273_v40 = vpop.f32.mrb[69].mxu1  ;;  %4932 = vmatprep.subr.bf16.mxu0 %v5436_v30  ;;  %v6916_v0 = vld [vmem:[%s7000_s6 + $0x9] ss:$0 sm:$0xff] }
 0x996   : > { %v3274_v36 = vadd.f32 %v6884_v31, %v3273_v40  ;;  %v4881_v29 = vpop.f32.mrb[70].mxu1  ;;  %4906 = vmatprep.mubr.bf16.mxu1 %v3336_v12  ;;  %4933 = vmatpush3.bf16.msra.mxu0 %v5436_v30 }
 0x997   : > { %v3285_v59 = vadd.f32 %v4881_v29, %v6884_v31  ;;  %v3276_v19 = vpop.f32.mrb[71].mxu1  ;;  %4907 = vmatmul.mubr.bf16.vlgmr.msra.gmra.mrb[80].mxu1 %v3337_v7  ;;  %v3326_v50 = vmax.f32 %v3282_v41, 0.0 }
 0x998   : > { %v3277_v18 = vadd.f32 %v6884_v31, %v3276_v19  ;;  %4962 = vmatpush3.bf16.msra.mxu1 %v5431_v5  ;;  %v3324_v60 = vmax.f32 %v3274_v36, 0.0 }
 0x999   : > { %v3327_v61 = vmax.f32 %v3285_v59, 0.0  ;;  %4955 = vmatprep.subr.bf16.mxu1 %v5432_v27 }
 0x99a   : > { %v3325_v57 = vmax.f32 %v3277_v18, 0.0 }
 0x99b   : > { %v3339_v3 = vpack.c.bf16 %v3327_v61, %v3326_v50 }
 0x99c   : > { %v3338_v33 = vpack.c.bf16 %v3325_v57, %v3324_v60  ;;  %v4884_v34 = vpop.f32.mrb[72].mxu1  ;;  %4963 = vmatpush3.bf16.msra.mxu1 %v5432_v27 }
 0x99d   : > { %v3298_v46 = vadd.f32 %v4884_v34, %v6884_v31  ;;  %v3289_v63 = vpop.f32.mrb[73].mxu1  ;;  %4956 = vmatprep.subr.bf16.mxu1 %v5433_v55 }
 0x99e   : > { %v3290_v14 = vadd.f32 %v6884_v31, %v3289_v63  ;;  %v4885_v53 = vpop.f32.mrb[74].mxu1  ;;  %4910 = vmatprep.mubr.bf16.mxu1 %v3338_v33 }
 0x99f   : > { %v3301_v49 = vadd.f32 %v4885_v53, %v6884_v31  ;;  %v3292_v26 = vpop.f32.mrb[75].mxu1  ;;  %4911 = vmatmul.mubr.bf16.gmra.mrb[84].mxu1 %v3339_v3  ;;  %v3330_v4 = vmax.f32 %v3298_v46, 0.0 }
 0x9a0   : > { %v3293_v35 = vadd.f32 %v6884_v31, %v3292_v26  ;;  %4964 = vmatpush3.bf16.msra.mxu1 %v5433_v55  ;;  %v3328_v38 = vmax.f32 %v3290_v14, 0.0 }
 0x9a1   : > { %v3331_v32 = vmax.f32 %v3301_v49, 0.0  ;;  %4957 = vmatprep.subr.bf16.mxu1 %v5434_v13 }
 0x9a2   : > { %v3329_v6 = vmax.f32 %v3293_v35, 0.0 }
 0x9a3   : > { %v3341_v52 = vpack.c.bf16 %v3331_v32, %v3330_v4 }
 0x9a4   : > { %v3340_v42 = vpack.c.bf16 %v3329_v6, %v3328_v38  ;;  %v4888_v5 = vpop.f32.mrb[76].mxu1  ;;  %4965 = vmatpush3.bf16.msra.mxu1 %v5434_v13 }
 0x9a5   : > { %v3314_v27 = vadd.f32 %v4888_v5, %v6884_v31  ;;  %v3305_v9 = vpop.f32.mrb[77].mxu1  ;;  %4958 = vmatprep.subr.bf16.mxu1 %v6877_v2 }
 0x9a6   : > { %v3306_v23 = vadd.f32 %v6884_v31, %v3305_v9  ;;  %v4889_v28 = vpop.f32.mrb[78].mxu1  ;;  %4914 = vmatprep.mubr.bf16.mxu1 %v3340_v42 }
 0x9a7   : > { %v3317_v55 = vadd.f32 %v4889_v28, %v6884_v31  ;;  %v3308_v45 = vpop.f32.mrb[79].mxu1  ;;  %4915 = vmatmul.mubr.bf16.gmra.mrb[88].mxu1 %v3341_v52  ;;  %v3334_v47 = vmax.f32 %v3314_v27, 0.0 }
 0x9a8   : > { %v3309_v37 = vadd.f32 %v6884_v31, %v3308_v45  ;;  %4966 = vmatpush3.bf16.msra.mxu1 %v6877_v2  ;;  %v3332_v13 = vmax.f32 %v3306_v23, 0.0  ;;  %v5437_v2 = vld [vmem:[%s7001_s7 + $0x30] sm:$0xff]   ;;  %v5438_v31 = vld [vmem:[%s7001_s7 + $0x38] sm:$0xff]  }
 0x9a9   : > { %v3335_v56 = vmax.f32 %v3317_v55, 0.0  ;;  %4959 = vmatprep.subr.bf16.mxu1 %v5436_v30  ;;  %4934 = vmatprep.subr.bf16.mxu0 %v5437_v2 }
 0x9aa   : > { %v3333_v48 = vmax.f32 %v3309_v37, 0.0  ;;  %4935 = vmatpush3.bf16.msra.mxu0 %v5437_v2 }
 0x9ab   : > { %v3343_v20 = vpack.c.bf16 %v3335_v56, %v3334_v47  ;;  %4936 = vmatprep.subr.bf16.mxu0 %v5438_v31 }
 0x9ac   : > { %v3342_v15 = vpack.c.bf16 %v3333_v48, %v3332_v13  ;;  %4967 = vmatpush3.bf16.msra.mxu1 %v5436_v30 }
 0x9ad   : > { %4960 = vmatprep.subr.bf16.mxu1 %v5437_v2 }
 0x9ae   : > { %4918 = vmatprep.mubr.bf16.mxu1 %v3342_v15  ;;  %4937 = vmatpush3.bf16.msra.mxu0 %v5438_v31 }
 0x9af   : > { %4919 = vmatmul.mubr.bf16.gmra.mrb[92].mxu1 %v3343_v20 }
 0x9b0   : > { %4968 = vmatpush3.bf16.msra.mxu1 %v5437_v2 }
 0x9b1   : > { %4961 = vmatprep.subr.bf16.mxu1 %v5438_v31 }
 0x9b4   : > { %4969 = vmatpush3.bf16.msra.mxu1 %v5438_v31 }
 0xa6a   : > { %v4908_v7 = vpop.f32.mrb[80].mxu1 }
 0xa6b   : > { %v3460_v12 = vadd.f32 %v4908_v7, %v6916_v0  ;;  %v3451_v8 = vpop.f32.mrb[81].mxu1 }
 0xa6c   : > { %v3452_v41 = vadd.f32 %v6916_v0, %v3451_v8  ;;  %v4909_v40 = vpop.f32.mrb[82].mxu1 }
 0xa6d   : > { %v3516_v36 = vadd.f32 %v6756_v16, %v3460_v12  ;;  %v3463_v29 = vadd.f32 %v4909_v40, %v6916_v0  ;;  %v3454_v59 = vpop.f32.mrb[83].mxu1 }
 0xa6e   : > { %v3514_v19 = vadd.f32 %v6763_v62, %v3452_v41  ;;  %v3455_v18 = vadd.f32 %v6916_v0, %v3454_v59 }
 0xa6f   : > { %v3517_v50 = vadd.f32 %v6758_v54, %v3463_v29  ;;  %v3532_v60 = vmax.f32 %v3516_v36, 0.0 }
 0xa70   : > { %v3515_v61 = vadd.f32 %v6765_v22, %v3455_v18  ;;  %v3530_v3 = vmax.f32 %v3514_v19, 0.0 }
 0xa71   : > { %v3533_v57 = vmax.f32 %v3517_v50, 0.0 }
 0xa72   : > { %v3531_v33 = vmax.f32 %v3515_v61, 0.0  ;;  %v4912_v34 = vpop.f32.mrb[84].mxu1 }
 0xa73   : > { %v3547_v46 = vpack.c.bf16 %v3533_v57, %v3532_v60  ;;  %v3476_v63 = vadd.f32 %v4912_v34, %v6916_v0  ;;  %v3467_v16 = vpop.f32.mrb[85].mxu1 }
 0xa74   : > { %v3468_v14 = vadd.f32 %v6916_v0, %v3467_v16  ;;  %v4913_v53 = vpop.f32.mrb[86].mxu1  ;;  %v3546_v49 = vpack.c.bf16 %v3531_v33, %v3530_v3 }
 0xa75   : > { %v3520_v62 = vadd.f32 %v6779_v24, %v3476_v63  ;;  %v3479_v26 = vadd.f32 %v4913_v53, %v6916_v0  ;;  %v3470_v54 = vpop.f32.mrb[87].mxu1 }
 0xa76   : > { %v3518_v22 = vadd.f32 %v6785_v1, %v3468_v14  ;;  %v3471_v35 = vadd.f32 %v6916_v0, %v3470_v54  ;;  %4938 = vmatprep.mubr.bf16.mxu0 %v3546_v49 }
 0xa77   : > { %v3521_v4 = vadd.f32 %v6788_v10, %v3479_v26  ;;  %4939 = vmatmul.mubr.bf16.vlgmr.msra.gmra.mrb[80].mxu0 %v3547_v46  ;;  %v3536_v38 = vmax.f32 %v3520_v62, 0.0 }
 0xa78   : > { %v3519_v32 = vadd.f32 %v6792_v11, %v3471_v35  ;;  %v3534_v52 = vmax.f32 %v3518_v22, 0.0 }
 0xa79   : > { %v3537_v6 = vmax.f32 %v3521_v4, 0.0 }
 0xa7a   : > { %v3535_v42 = vmax.f32 %v3519_v32, 0.0  ;;  %v4916_v5 = vpop.f32.mrb[88].mxu1 }
 0xa7b   : > { %v3492_v24 = vadd.f32 %v4916_v5, %v6916_v0  ;;  %v3483_v27 = vpop.f32.mrb[89].mxu1  ;;  %v3549_v9 = vpack.c.bf16 %v3537_v6, %v3536_v38 }
 0xa7c   : > { %v3484_v23 = vadd.f32 %v6916_v0, %v3483_v27  ;;  %v4917_v1 = vpop.f32.mrb[90].mxu1  ;;  %v3548_v28 = vpack.c.bf16 %v3535_v42, %v3534_v52 }
 0xa7d   : > { %v3524_v55 = vadd.f32 %v6809_v58, %v3492_v24  ;;  %v3495_v10 = vadd.f32 %v4917_v1, %v6916_v0  ;;  %v3486_v45 = vpop.f32.mrb[91].mxu1 }
 0xa7e   : > { %v3522_v11 = vadd.f32 %v6815_v25, %v3484_v23  ;;  %v3487_v37 = vadd.f32 %v6916_v0, %v3486_v45  ;;  %4942 = vmatprep.mubr.bf16.mxu0 %v3548_v28 }
 0xa7f   : > { %v3525_v47 = vadd.f32 %v6818_v44, %v3495_v10  ;;  %4943 = vmatmul.mubr.bf16.gmra.mrb[84].mxu0 %v3549_v9  ;;  %v3540_v13 = vmax.f32 %v3524_v55, 0.0 }
 0xa80   : > { %v3523_v56 = vadd.f32 %v6822_v21, %v3487_v37  ;;  %v3538_v20 = vmax.f32 %v3522_v11, 0.0 }
 0xa81   : > { %v3541_v48 = vmax.f32 %v3525_v47, 0.0 }
 0xa82   : > { %v3539_v15 = vmax.f32 %v3523_v56, 0.0  ;;  %v4920_v30 = vpop.f32.mrb[92].mxu1 }
 0xa83   : > { %v3551_v2 = vpack.c.bf16 %v3541_v48, %v3540_v13  ;;  %v3508_v58 = vadd.f32 %v4920_v30, %v6916_v0  ;;  %v3499_v31 = vpop.f32.mrb[93].mxu1 }
 0xa84   : > { %v3500_v7 = vadd.f32 %v6916_v0, %v3499_v31  ;;  %v4921_v25 = vpop.f32.mrb[94].mxu1  ;;  %v3550_v12 = vpack.c.bf16 %v3539_v15, %v3538_v20 }
 0xa85   : > { %v3528_v8 = vadd.f32 %v6839_v39, %v3508_v58  ;;  %v3511_v44 = vadd.f32 %v4921_v25, %v6916_v0  ;;  %v3502_v41 = vpop.f32.mrb[95].mxu1 }
 0xa86   : > { %v3526_v21 = vadd.f32 %v6845_v43, %v3500_v7  ;;  %v3503_v40 = vadd.f32 %v6916_v0, %v3502_v41  ;;  %4946 = vmatprep.mubr.bf16.mxu1 %v3550_v12  ;;  %v4127_v43 = vld [vmem:[%s7002_s8] ss:$0 sm:$0xff] }
 0xa87   : > { %v3529_v36 = vadd.f32 %v6848_v17, %v3511_v44  ;;  %4947 = vmatmul.mubr.bf16.vlgmr.msra.gmra.mrb[96].mxu1 %v3551_v2  ;;  %v3544_v59 = vmax.f32 %v3528_v8, 0.0 }
 0xa88   : > { %v3527_v29 = vadd.f32 %v6850_v51, %v3503_v40  ;;  %v3542_v18 = vmax.f32 %v3526_v21, 0.0 }
 0xa89   : > { %v3545_v19 = vmax.f32 %v3529_v36, 0.0 }
 0xa8a   : > { %v3543_v50 = vmax.f32 %v3527_v29, 0.0 }
 0xa8b   : > { %v3553_v61 = vpack.c.bf16 %v3545_v19, %v3544_v59 }
 0xa8c   : > { %v3552_v39 = vpack.c.bf16 %v3543_v50, %v3542_v18 }
 0xa8e   : > { %4950 = vmatprep.mubr.bf16.mxu1 %v3552_v39 }
 0xa8f   : > { %4951 = vmatmul.mubr.bf16.gmra.mrb[100].mxu1 %v3553_v61 }
 0xb4a   : > { %v4940_v17 = vpop.f32.mrb[80].mxu0 }
 0xb4b   : > { %v3668_v51 = vadd.f32 %v4940_v17, %v4127_v43  ;;  %v3659_v0 = vpop.f32.mrb[81].mxu0 }
 0xb4c   : > { %v3660_v60 = vadd.f32 %v4127_v43, %v3659_v0  ;;  %v4941_v57 = vpop.f32.mrb[82].mxu0 }
 0xb4d   : > { %3725 = vst.msk [vmem:[%s6957_s23 + $0x10] sm:$0xff] %vm3722_vm0, %v3668_v51  ;;  %v3671_v3 = vadd.f32 %v4941_v57, %v4127_v43  ;;  %v3662_v33 = vpop.f32.mrb[83].mxu0 }
 0xb4e   : > { %3723 = vst.msk [vmem:[%s6957_s23] sm:$0xff] %vm3722_vm0, %v3660_v60  ;;  %v3663_v34 = vadd.f32 %v4127_v43, %v3662_v33 }
 0xb4f   : > { %3726 = vst.msk [vmem:[%s6957_s23 + $0x18] sm:$0xff] %vm3722_vm0, %v3671_v3 }
 0xb50   : > { %3724 = vst.msk [vmem:[%s6957_s23 + $0x8] sm:$0xff] %vm3722_vm0, %v3663_v34 }
 0xb52   : > { %v4944_v46 = vpop.f32.mrb[84].mxu0 }
 0xb53   : > { %v3684_v63 = vadd.f32 %v4944_v46, %v4127_v43  ;;  %v3675_v16 = vpop.f32.mrb[85].mxu0 }
 0xb54   : > { %v3676_v14 = vadd.f32 %v4127_v43, %v3675_v16  ;;  %v4945_v53 = vpop.f32.mrb[86].mxu0 }
 0xb55   : > { %3729 = vst.msk [vmem:[%s6957_s23 + $0x30] sm:$0xff] %vm3722_vm0, %v3684_v63  ;;  %v3687_v49 = vadd.f32 %v4945_v53, %v4127_v43  ;;  %v3678_v62 = vpop.f32.mrb[87].mxu0 }
 0xb56   : > { %3727 = vst.msk [vmem:[%s6957_s23 + $0x20] sm:$0xff] %vm3722_vm0, %v3676_v14  ;;  %v3679_v26 = vadd.f32 %v4127_v43, %v3678_v62 }
 0xb57   : > { %3730 = vst.msk [vmem:[%s6957_s23 + $0x38] sm:$0xff] %vm3722_vm0, %v3687_v49 }
 0xb58   : > { %3728 = vst.msk [vmem:[%s6957_s23 + $0x28] sm:$0xff] %vm3722_vm0, %v3679_v26 }
 0xb5a   : > { %v4948_v54 = vpop.f32.mrb[96].mxu1 }
 0xb5b   : > { %v3700_v22 = vadd.f32 %v4948_v54, %v4127_v43  ;;  %v3691_v35 = vpop.f32.mrb[97].mxu1 }
 0xb5c   : > { %v3692_v4 = vadd.f32 %v4127_v43, %v3691_v35  ;;  %v4949_v32 = vpop.f32.mrb[98].mxu1 }
 0xb5d   : > { %3733 = vst.msk [vmem:[%s6957_s23 + $0x50] sm:$0xff] %vm3722_vm0, %v3700_v22  ;;  %v3703_v38 = vadd.f32 %v4949_v32, %v4127_v43  ;;  %v3694_v6 = vpop.f32.mrb[99].mxu1 }
 0xb5e   : > { %3731 = vst.msk [vmem:[%s6957_s23 + $0x40] sm:$0xff] %vm3722_vm0, %v3692_v4  ;;  %v3695_v52 = vadd.f32 %v4127_v43, %v3694_v6 }
 0xb5f   : > { %3734 = vst.msk [vmem:[%s6957_s23 + $0x58] sm:$0xff] %vm3722_vm0, %v3703_v38 }
 0xb60   : > { %3732 = vst.msk [vmem:[%s6957_s23 + $0x48] sm:$0xff] %vm3722_vm0, %v3695_v52 }
 0xb62   : > { %v4952_v42 = vpop.f32.mrb[100].mxu1 }
 0xb63   : > { %v3716_v5 = vadd.f32 %v4952_v42, %v4127_v43  ;;  %v3707_v24 = vpop.f32.mrb[101].mxu1 }
 0xb64   : > { %v3708_v27 = vadd.f32 %v4127_v43, %v3707_v24  ;;  %v4953_v9 = vpop.f32.mrb[102].mxu1 }
 0xb65   : > { %3737 = vst.msk [vmem:[%s6957_s23 + $0x70] sm:$0xff] %vm3722_vm0, %v3716_v5  ;;  %v3719_v23 = vadd.f32 %v4953_v9, %v4127_v43  ;;  %v3710_v1 = vpop.f32.mrb[103].mxu1 }
 0xb66   : > { %3735 = vst.msk [vmem:[%s6957_s23 + $0x60] sm:$0xff] %vm3722_vm0, %v3708_v27  ;;  %v3711_v28 = vadd.f32 %v4127_v43, %v3710_v1 }
 0xb67   : > { %3738 = vst.msk [vmem:[%s6957_s23 + $0x78] sm:$0xff] %vm3722_vm0, %v3719_v23 }
 0xb68   : > { %3736 = vst.msk [vmem:[%s6957_s23 + $0x68] sm:$0xff] %vm3722_vm0, %v3711_v28 }
 0xb69 PF: > { %s20_s30 = sadd.s32 1, %s5493_s30  }
 0xb6a   : > { %p17_p3 = scmp.ge.s32.totalorder %s20_s30, 4  }
 0xb6c   :  { %19 = sbr.rel (!%p17_p3) target bundleno = 1 (0x1), region = 117 }
 0xb73   :  { %3761 = vsyncpa [#allocation3], 1 }
 0xb74   :  { %3763 = vsyncpa [#allocation3 + $0x1], 1 }

</bundles_post_ra>
